<compile_context>
chip_gen: v6e
topology: v6e:2x2x1
jax: 0.10.0
libtpu: 0.0.40
codegen_flags: <defaults>
</compile_context>

<pallas_src>
import functools

import jax
import jax.numpy as jnp
import numpy as np
from jax import lax
from jax.experimental import pallas as pl
from jax.experimental.pallas import tpu as pltpu

HIDDEN = 32          # H ; 4H = 128 = exactly one lane tile
VOCAB = 16
BATCH = 2
SEQ = 8

LANE = 128
SLAB_ROWS = 104      # 8 (bias/row band) + 64 (fused RHS) + 32 (linear head)


def _lstm_kernel(x_ref, w_ref, out_ref, *, hidden, seq):
    H = hidden
    B = x_ref.shape[0]
    G = 4 * H                                   # 128 gate lanes

    # --- unpack the packed weight slab (all slices are 8/128 aligned) -------
    w_row  = w_ref[0:1, 0:G]                    # (1,4H) W_ih_l0 row (g-scaled)
    b1     = w_ref[0:1, G:2 * G]                # (1,4H) b_ih_l0+b_hh_l0 (g-scaled)
    b2     = w_ref[1:2, 0:G]                    # (1,4H) b_ih_l1+b_hh_l1 (g-scaled)
    blin   = w_ref[1:2, G:G + LANE]             # (1,128) linear bias (lanes>=V are 0)
    w_fused = w_ref[8:8 + 2 * H, :]             # (2H,8H) [[Wih1^T|Whh0^T],[Whh1^T|0]]
    wlin   = w_ref[8 + 2 * H:8 + 3 * H, 0:LANE]  # (H,128) linear weight, lane-padded

    def cell(gates, c):
        # One sigmoid push over the whole (B,4H) tile.  The g-gate columns
        # were pre-scaled by 2, so g = tanh(z) = 2*sigmoid(2z) - 1 falls out of
        # the same push -> 2 EUP pushes per cell (sigmoid + tanh(c_new)).
        sig = jax.nn.sigmoid(gates)
        i = sig[:, 0:H]
        f = sig[:, H:2 * H]
        g = 2.0 * sig[:, 2 * H:3 * H] - 1.0
        o = sig[:, 3 * H:4 * H]
        c_new = f * c + i * g
        h_new = o * jnp.tanh(c_new)
        return h_new, c_new

    zeros_bh = jnp.zeros((B, H), jnp.float32)

    c1 = zeros_bh
    c2 = zeros_bh
    h2 = zeros_bh
    h2_band = jnp.zeros((B, 2 * H), jnp.float32)   # h2_{t-1} pre-placed in lanes [H:2H)
    rec1 = jnp.zeros((B, G), jnp.float32)          # h1_{t-1} @ Whh0^T (from fused dot)

    # Small static trip count: fully unroll.
    for t in range(seq):
        # Layer-1 gates.  The x contribution is a tiny outer product computed
        # here (independent of the recurrence, so it hides under other work);
        # the recurrent term came out of the previous step's fused matmul.
        gates1 = x_ref[:, t:t + 1] * w_row + b1 + rec1
        h1, c1 = cell(gates1, c1)

        # Fused matmul: lanes [0,4H)  -> layer-2 gates of step t (pre-bias),
        #               lanes [4H,8H) -> h1_t @ Whh0^T for step t+1's layer 1.
        # h2_{t-1} was shifted into lanes [H:2H) right after it was produced,
        # so only a cheap select/add (no lane relayout) sits on the chain here.
        lhs = jnp.concatenate([h1, zeros_bh], axis=1) + h2_band     # (B, 2H)
        fused = jnp.dot(lhs, w_fused, preferred_element_type=jnp.float32)
        gates2 = fused[:, 0:G] + b2
        rec1 = fused[:, G:2 * G]

        h2, c2 = cell(gates2, c2)
        h2_band = jnp.concatenate([zeros_bh, h2], axis=1)           # off-chain shift

    # Linear head on the last top-layer hidden state; lane-dense 128-wide
    # output avoids a masked vst (wrapper slices back to V).
    out_ref[...] = (jnp.dot(h2, wlin, preferred_element_type=jnp.float32)
                    + blin)


def prepare_weights(params):
    """One-time parameter packing (NOT per forward call)."""
    H = params["w_hh_l0"].shape[1]
    V = params["w_lin"].shape[0]
    G = 4 * H
    assert G == LANE and V <= LANE, "packing layout assumes 4*H == 128"

    # Fold the 2x of tanh(z) = 2*sigmoid(2z) - 1 into the g-gate columns.
    gscale = jnp.concatenate([jnp.ones((2 * H,), jnp.float32),
                              jnp.full((H,), 2.0, jnp.float32),
                              jnp.ones((H,), jnp.float32)])         # (4H,)

    w_row = params["w_ih_l0"][:, 0] * gscale                        # (4H,)
    b1 = (params["b_ih_l0"] + params["b_hh_l0"]) * gscale           # (4H,)
    b2 = (params["b_ih_l1"] + params["b_hh_l1"]) * gscale           # (4H,)

    whh0_t = params["w_hh_l0"].T * gscale[None, :]                  # (H, 4H)
    wih1_t = params["w_ih_l1"].T * gscale[None, :]                  # (H, 4H)
    whh1_t = params["w_hh_l1"].T * gscale[None, :]                  # (H, 4H)

    w_fused = jnp.concatenate(
        [jnp.concatenate([wih1_t, whh0_t], axis=1),
         jnp.concatenate([whh1_t, jnp.zeros((H, G), jnp.float32)], axis=1)],
        axis=0)                                                     # (2H, 8H)

    slab = jnp.zeros((SLAB_ROWS, 2 * LANE), jnp.float32)
    slab = slab.at[0, 0:G].set(w_row)
    slab = slab.at[0, G:2 * G].set(b1)
    slab = slab.at[1, 0:G].set(b2)
    slab = slab.at[1, G:G + V].set(params["b_lin"])
    slab = slab.at[8:8 + 2 * H, :].set(w_fused)
    slab = slab.at[8 + 2 * H:8 + 3 * H, 0:V].set(params["w_lin"].T)
    return slab


@jax.jit
def char_predictor_forward(x, w_slab):
    """x: (B, T, 1) float32, w_slab: packed weights. Returns (B, V) logits."""
    B, T, _ = x.shape
    x2d = x[..., 0].astype(jnp.float32)                             # (B, T)
    kernel = functools.partial(_lstm_kernel, hidden=HIDDEN, seq=T)
    out = pl.pallas_call(
        kernel,
        out_shape=jax.ShapeDtypeStruct((B, LANE), jnp.float32),
        in_specs=[pl.BlockSpec(memory_space=pltpu.MemorySpace.VMEM),
                  pl.BlockSpec(memory_space=pltpu.MemorySpace.VMEM)],
        out_specs=pl.BlockSpec(memory_space=pltpu.MemorySpace.VMEM),
    )(x2d, w_slab)
    return out[:, :VOCAB]


def init_params(key, hidden, vocab):
    """Deterministic init mirroring nn.LSTM / nn.Linear parameter shapes."""
    ks = jax.random.split(key, 10)
    s = 1.0 / np.sqrt(hidden)
    u = lambda k, shape: jax.random.uniform(k, shape, jnp.float32, -s, s)
    return {
        "w_ih_l0": u(ks[0], (4 * hidden, 1)),
        "w_hh_l0": u(ks[1], (4 * hidden, hidden)),
        "b_ih_l0": u(ks[2], (4 * hidden,)),
        "b_hh_l0": u(ks[3], (4 * hidden,)),
        "w_ih_l1": u(ks[4], (4 * hidden, hidden)),
        "w_hh_l1": u(ks[5], (4 * hidden, hidden)),
        "b_ih_l1": u(ks[6], (4 * hidden,)),
        "b_hh_l1": u(ks[7], (4 * hidden,)),
        "w_lin":   u(ks[8], (vocab, hidden)),
        "b_lin":   u(ks[9], (vocab,)),
    }


def reference_forward(x, params):
    """Pure-JAX reference (eval-mode) of the PyTorch forward."""
    H = params["w_hh_l0"].shape[1]
    B, T, _ = x.shape

    def lstm_layer(seq, w_ih, w_hh, b_ih, b_hh):
        def cell(carry, x_t):
            h, c = carry
            gates = x_t @ w_ih.T + h @ w_hh.T + b_ih + b_hh
            i = jax.nn.sigmoid(gates[:, 0:H])
            f = jax.nn.sigmoid(gates[:, H:2 * H])
            g = jnp.tanh(gates[:, 2 * H:3 * H])
            o = jax.nn.sigmoid(gates[:, 3 * H:4 * H])
            c = f * c + i * g
            h = o * jnp.tanh(c)
            return (h, c), h
        init = (jnp.zeros((B, H), jnp.float32), jnp.zeros((B, H), jnp.float32))
        _, hs = lax.scan(cell, init, jnp.swapaxes(seq, 0, 1))
        return jnp.swapaxes(hs, 0, 1)

    h1 = lstm_layer(x, params["w_ih_l0"], params["w_hh_l0"],
                    params["b_ih_l0"], params["b_hh_l0"])
    h2 = lstm_layer(h1, params["w_ih_l1"], params["w_hh_l1"],
                    params["b_ih_l1"], params["b_hh_l1"])
    last = h2[:, -1, :]
    return last @ params["w_lin"].T + params["b_lin"]


if __name__ == "__main__":
    key = jax.random.PRNGKey(0)
    k_x, k_p = jax.random.split(key)
    x = jax.random.normal(k_x, (BATCH, SEQ, 1), jnp.float32)
    params = init_params(k_p, HIDDEN, VOCAB)

    w_slab = jax.block_until_ready(prepare_weights(params))  # one-time packing

    out = char_predictor_forward(x, w_slab)
    out = jax.block_until_ready(out)

    ref = reference_forward(x, params)
    np.testing.assert_allclose(np.asarray(out), np.asarray(ref),
                               rtol=1e-4, atol=1e-4)
    assert out.shape == (BATCH, VOCAB)
    print("KERNEL_OK")
</pallas_src>

<mosaic_0001>
module attributes {stable_mosaic.version = 11 : i64} {
  func.func @_lstm_kernel(%arg0: memref<2x8xf32, #tpu.memory_space<vmem>>, %arg1: memref<104x256xf32, #tpu.memory_space<vmem>>, %arg2: memref<2x128xf32, #tpu.memory_space<vmem>>) attributes {dimension_semantics = [], scalar_prefetch = 0 : i64, scratch_operands = 0 : i64, tpu.core_type = #tpu.core_type<tc>} {
    %c0 = arith.constant 0 : index
    %c0_0 = arith.constant 0 : index
    %0 = vector.load %arg1[%c0, %c0_0] : memref<104x256xf32, #tpu.memory_space<vmem>>, vector<1x128xf32>
    %c0_1 = arith.constant 0 : index
    %c128 = arith.constant 128 : index
    %1 = vector.load %arg1[%c0_1, %c128] : memref<104x256xf32, #tpu.memory_space<vmem>>, vector<1x128xf32>
    %c1 = arith.constant 1 : index
    %c0_2 = arith.constant 0 : index
    %2 = vector.load %arg1[%c1, %c0_2] : memref<104x256xf32, #tpu.memory_space<vmem>>, vector<1x128xf32>
    %c1_3 = arith.constant 1 : index
    %c128_4 = arith.constant 128 : index
    %3 = vector.load %arg1[%c1_3, %c128_4] : memref<104x256xf32, #tpu.memory_space<vmem>>, vector<1x128xf32>
    %c8 = arith.constant 8 : index
    %c0_5 = arith.constant 0 : index
    %4 = vector.load %arg1[%c8, %c0_5] : memref<104x256xf32, #tpu.memory_space<vmem>>, vector<64x256xf32>
    %c72 = arith.constant 72 : index
    %c0_6 = arith.constant 0 : index
    %5 = vector.load %arg1[%c72, %c0_6] : memref<104x256xf32, #tpu.memory_space<vmem>>, vector<32x128xf32>
    %cst = arith.constant 0.000000e+00 : f32
    %6 = vector.broadcast %cst : f32 to vector<2x32xf32>
    %cst_7 = arith.constant 0.000000e+00 : f32
    %7 = vector.broadcast %cst_7 : f32 to vector<2x64xf32>
    %cst_8 = arith.constant 0.000000e+00 : f32
    %8 = vector.broadcast %cst_8 : f32 to vector<2x128xf32>
    %c0_9 = arith.constant 0 : index
    %c0_10 = arith.constant 0 : index
    %9 = vector.load %arg0[%c0_9, %c0_10] : memref<2x8xf32, #tpu.memory_space<vmem>>, vector<2x1xf32>
    %10 = vector.broadcast %9 : vector<2x1xf32> to vector<2x128xf32>
    %11 = vector.broadcast %0 : vector<1x128xf32> to vector<2x128xf32>
    %12 = arith.mulf %10, %11 : vector<2x128xf32>
    %13 = vector.broadcast %1 : vector<1x128xf32> to vector<2x128xf32>
    %14 = arith.addf %12, %13 : vector<2x128xf32>
    %15 = arith.addf %14, %8 : vector<2x128xf32>
    %16 = arith.negf %15 : vector<2x128xf32>
    %17 = math.exp %16 : vector<2x128xf32>
    %cst_11 = arith.constant 1.000000e+00 : f32
    %18 = vector.broadcast %cst_11 : f32 to vector<2x128xf32>
    %19 = arith.addf %18, %17 : vector<2x128xf32>
    %20 = arith.divf %18, %19 : vector<2x128xf32>
    %21 = vector.extract_strided_slice %20 {offsets = [0, 0], sizes = [2, 32], strides = [1, 1]} : vector<2x128xf32> to vector<2x32xf32>
    %22 = vector.extract_strided_slice %20 {offsets = [0, 32], sizes = [2, 32], strides = [1, 1]} : vector<2x128xf32> to vector<2x32xf32>
    %23 = vector.extract_strided_slice %20 {offsets = [0, 64], sizes = [2, 32], strides = [1, 1]} : vector<2x128xf32> to vector<2x32xf32>
    %cst_12 = arith.constant 2.000000e+00 : f32
    %24 = vector.broadcast %cst_12 : f32 to vector<2x32xf32>
    %25 = arith.mulf %24, %23 : vector<2x32xf32>
    %cst_13 = arith.constant 1.000000e+00 : f32
    %26 = vector.broadcast %cst_13 : f32 to vector<2x32xf32>
    %27 = arith.subf %25, %26 : vector<2x32xf32>
    %28 = vector.extract_strided_slice %20 {offsets = [0, 96], sizes = [2, 32], strides = [1, 1]} : vector<2x128xf32> to vector<2x32xf32>
    %29 = arith.mulf %22, %6 : vector<2x32xf32>
    %30 = arith.mulf %21, %27 : vector<2x32xf32>
    %31 = arith.addf %29, %30 : vector<2x32xf32>
    %32 = math.tanh %31 : vector<2x32xf32>
    %33 = arith.mulf %28, %32 : vector<2x32xf32>
    %34 = tpu.concatenate %33, %6 in 1 : vector<2x32xf32>, vector<2x32xf32> -> vector<2x64xf32>
    %35 = arith.addf %34, %7 : vector<2x64xf32>
    %cst_14 = arith.constant dense<0.000000e+00> : vector<2x256xf32>
    %36 = tpu.matmul %35, %4, %cst_14 {dimension_numbers = #tpu.dot_dimension_numbers<[1], [0], [0], [1], [0, 0, 1, 1], [], []>} : vector<2x64xf32>, vector<64x256xf32>, vector<2x256xf32> -> vector<2x256xf32>
    %37 = vector.extract_strided_slice %36 {offsets = [0, 0], sizes = [2, 128], strides = [1, 1]} : vector<2x256xf32> to vector<2x128xf32>
    %38 = vector.broadcast %2 : vector<1x128xf32> to vector<2x128xf32>
    %39 = arith.addf %37, %38 : vector<2x128xf32>
    %40 = vector.extract_strided_slice %36 {offsets = [0, 128], sizes = [2, 128], strides = [1, 1]} : vector<2x256xf32> to vector<2x128xf32>
    %41 = arith.negf %39 : vector<2x128xf32>
    %42 = math.exp %41 : vector<2x128xf32>
    %cst_15 = arith.constant 1.000000e+00 : f32
    %43 = vector.broadcast %cst_15 : f32 to vector<2x128xf32>
    %44 = arith.addf %43, %42 : vector<2x128xf32>
    %45 = arith.divf %43, %44 : vector<2x128xf32>
    %46 = vector.extract_strided_slice %45 {offsets = [0, 0], sizes = [2, 32], strides = [1, 1]} : vector<2x128xf32> to vector<2x32xf32>
    %47 = vector.extract_strided_slice %45 {offsets = [0, 32], sizes = [2, 32], strides = [1, 1]} : vector<2x128xf32> to vector<2x32xf32>
    %48 = vector.extract_strided_slice %45 {offsets = [0, 64], sizes = [2, 32], strides = [1, 1]} : vector<2x128xf32> to vector<2x32xf32>
    %cst_16 = arith.constant 2.000000e+00 : f32
    %49 = vector.broadcast %cst_16 : f32 to vector<2x32xf32>
    %50 = arith.mulf %49, %48 : vector<2x32xf32>
    %cst_17 = arith.constant 1.000000e+00 : f32
    %51 = vector.broadcast %cst_17 : f32 to vector<2x32xf32>
    %52 = arith.subf %50, %51 : vector<2x32xf32>
    %53 = vector.extract_strided_slice %45 {offsets = [0, 96], sizes = [2, 32], strides = [1, 1]} : vector<2x128xf32> to vector<2x32xf32>
    %54 = arith.mulf %47, %6 : vector<2x32xf32>
    %55 = arith.mulf %46, %52 : vector<2x32xf32>
    %56 = arith.addf %54, %55 : vector<2x32xf32>
    %57 = math.tanh %56 : vector<2x32xf32>
    %58 = arith.mulf %53, %57 : vector<2x32xf32>
    %59 = tpu.concatenate %6, %58 in 1 : vector<2x32xf32>, vector<2x32xf32> -> vector<2x64xf32>
    %c0_18 = arith.constant 0 : index
    %c1_19 = arith.constant 1 : index
    %60 = vector.load %arg0[%c0_18, %c1_19] : memref<2x8xf32, #tpu.memory_space<vmem>>, vector<2x1xf32>
    %61 = vector.broadcast %60 : vector<2x1xf32> to vector<2x128xf32>
    %62 = vector.broadcast %0 : vector<1x128xf32> to vector<2x128xf32>
    %63 = arith.mulf %61, %62 : vector<2x128xf32>
    %64 = vector.broadcast %1 : vector<1x128xf32> to vector<2x128xf32>
    %65 = arith.addf %63, %64 : vector<2x128xf32>
    %66 = arith.addf %65, %40 : vector<2x128xf32>
    %67 = arith.negf %66 : vector<2x128xf32>
    %68 = math.exp %67 : vector<2x128xf32>
    %cst_20 = arith.constant 1.000000e+00 : f32
    %69 = vector.broadcast %cst_20 : f32 to vector<2x128xf32>
    %70 = arith.addf %69, %68 : vector<2x128xf32>
    %71 = arith.divf %69, %70 : vector<2x128xf32>
    %72 = vector.extract_strided_slice %71 {offsets = [0, 0], sizes = [2, 32], strides = [1, 1]} : vector<2x128xf32> to vector<2x32xf32>
    %73 = vector.extract_strided_slice %71 {offsets = [0, 32], sizes = [2, 32], strides = [1, 1]} : vector<2x128xf32> to vector<2x32xf32>
    %74 = vector.extract_strided_slice %71 {offsets = [0, 64], sizes = [2, 32], strides = [1, 1]} : vector<2x128xf32> to vector<2x32xf32>
    %cst_21 = arith.constant 2.000000e+00 : f32
    %75 = vector.broadcast %cst_21 : f32 to vector<2x32xf32>
    %76 = arith.mulf %75, %74 : vector<2x32xf32>
    %cst_22 = arith.constant 1.000000e+00 : f32
    %77 = vector.broadcast %cst_22 : f32 to vector<2x32xf32>
    %78 = arith.subf %76, %77 : vector<2x32xf32>
    %79 = vector.extract_strided_slice %71 {offsets = [0, 96], sizes = [2, 32], strides = [1, 1]} : vector<2x128xf32> to vector<2x32xf32>
    %80 = arith.mulf %73, %31 : vector<2x32xf32>
    %81 = arith.mulf %72, %78 : vector<2x32xf32>
    %82 = arith.addf %80, %81 : vector<2x32xf32>
    %83 = math.tanh %82 : vector<2x32xf32>
    %84 = arith.mulf %79, %83 : vector<2x32xf32>
    %85 = tpu.concatenate %84, %6 in 1 : vector<2x32xf32>, vector<2x32xf32> -> vector<2x64xf32>
    %86 = arith.addf %85, %59 : vector<2x64xf32>
    %cst_23 = arith.constant dense<0.000000e+00> : vector<2x256xf32>
    %87 = tpu.matmul %86, %4, %cst_23 {dimension_numbers = #tpu.dot_dimension_numbers<[1], [0], [0], [1], [0, 0, 1, 1], [], []>} : vector<2x64xf32>, vector<64x256xf32>, vector<2x256xf32> -> vector<2x256xf32>
    %88 = vector.extract_strided_slice %87 {offsets = [0, 0], sizes = [2, 128], strides = [1, 1]} : vector<2x256xf32> to vector<2x128xf32>
    %89 = vector.broadcast %2 : vector<1x128xf32> to vector<2x128xf32>
    %90 = arith.addf %88, %89 : vector<2x128xf32>
    %91 = vector.extract_strided_slice %87 {offsets = [0, 128], sizes = [2, 128], strides = [1, 1]} : vector<2x256xf32> to vector<2x128xf32>
    %92 = arith.negf %90 : vector<2x128xf32>
    %93 = math.exp %92 : vector<2x128xf32>
    %cst_24 = arith.constant 1.000000e+00 : f32
    %94 = vector.broadcast %cst_24 : f32 to vector<2x128xf32>
    %95 = arith.addf %94, %93 : vector<2x128xf32>
    %96 = arith.divf %94, %95 : vector<2x128xf32>
    %97 = vector.extract_strided_slice %96 {offsets = [0, 0], sizes = [2, 32], strides = [1, 1]} : vector<2x128xf32> to vector<2x32xf32>
    %98 = vector.extract_strided_slice %96 {offsets = [0, 32], sizes = [2, 32], strides = [1, 1]} : vector<2x128xf32> to vector<2x32xf32>
    %99 = vector.extract_strided_slice %96 {offsets = [0, 64], sizes = [2, 32], strides = [1, 1]} : vector<2x128xf32> to vector<2x32xf32>
    %cst_25 = arith.constant 2.000000e+00 : f32
    %100 = vector.broadcast %cst_25 : f32 to vector<2x32xf32>
    %101 = arith.mulf %100, %99 : vector<2x32xf32>
    %cst_26 = arith.constant 1.000000e+00 : f32
    %102 = vector.broadcast %cst_26 : f32 to vector<2x32xf32>
    %103 = arith.subf %101, %102 : vector<2x32xf32>
    %104 = vector.extract_strided_slice %96 {offsets = [0, 96], sizes = [2, 32], strides = [1, 1]} : vector<2x128xf32> to vector<2x32xf32>
    %105 = arith.mulf %98, %56 : vector<2x32xf32>
    %106 = arith.mulf %97, %103 : vector<2x32xf32>
    %107 = arith.addf %105, %106 : vector<2x32xf32>
    %108 = math.tanh %107 : vector<2x32xf32>
    %109 = arith.mulf %104, %108 : vector<2x32xf32>
    %110 = tpu.concatenate %6, %109 in 1 : vector<2x32xf32>, vector<2x32xf32> -> vector<2x64xf32>
    %c0_27 = arith.constant 0 : index
    %c2 = arith.constant 2 : index
    %111 = vector.load %arg0[%c0_27, %c2] : memref<2x8xf32, #tpu.memory_space<vmem>>, vector<2x1xf32>
    %112 = vector.broadcast %111 : vector<2x1xf32> to vector<2x128xf32>
    %113 = vector.broadcast %0 : vector<1x128xf32> to vector<2x128xf32>
    %114 = arith.mulf %112, %113 : vector<2x128xf32>
    %115 = vector.broadcast %1 : vector<1x128xf32> to vector<2x128xf32>
    %116 = arith.addf %114, %115 : vector<2x128xf32>
    %117 = arith.addf %116, %91 : vector<2x128xf32>
    %118 = arith.negf %117 : vector<2x128xf32>
    %119 = math.exp %118 : vector<2x128xf32>
    %cst_28 = arith.constant 1.000000e+00 : f32
    %120 = vector.broadcast %cst_28 : f32 to vector<2x128xf32>
    %121 = arith.addf %120, %119 : vector<2x128xf32>
    %122 = arith.divf %120, %121 : vector<2x128xf32>
    %123 = vector.extract_strided_slice %122 {offsets = [0, 0], sizes = [2, 32], strides = [1, 1]} : vector<2x128xf32> to vector<2x32xf32>
    %124 = vector.extract_strided_slice %122 {offsets = [0, 32], sizes = [2, 32], strides = [1, 1]} : vector<2x128xf32> to vector<2x32xf32>
    %125 = vector.extract_strided_slice %122 {offsets = [0, 64], sizes = [2, 32], strides = [1, 1]} : vector<2x128xf32> to vector<2x32xf32>
    %cst_29 = arith.constant 2.000000e+00 : f32
    %126 = vector.broadcast %cst_29 : f32 to vector<2x32xf32>
    %127 = arith.mulf %126, %125 : vector<2x32xf32>
    %cst_30 = arith.constant 1.000000e+00 : f32
    %128 = vector.broadcast %cst_30 : f32 to vector<2x32xf32>
    %129 = arith.subf %127, %128 : vector<2x32xf32>
    %130 = vector.extract_strided_slice %122 {offsets = [0, 96], sizes = [2, 32], strides = [1, 1]} : vector<2x128xf32> to vector<2x32xf32>
    %131 = arith.mulf %124, %82 : vector<2x32xf32>
    %132 = arith.mulf %123, %129 : vector<2x32xf32>
    %133 = arith.addf %131, %132 : vector<2x32xf32>
    %134 = math.tanh %133 : vector<2x32xf32>
    %135 = arith.mulf %130, %134 : vector<2x32xf32>
    %136 = tpu.concatenate %135, %6 in 1 : vector<2x32xf32>, vector<2x32xf32> -> vector<2x64xf32>
    %137 = arith.addf %136, %110 : vector<2x64xf32>
    %cst_31 = arith.constant dense<0.000000e+00> : vector<2x256xf32>
    %138 = tpu.matmul %137, %4, %cst_31 {dimension_numbers = #tpu.dot_dimension_numbers<[1], [0], [0], [1], [0, 0, 1, 1], [], []>} : vector<2x64xf32>, vector<64x256xf32>, vector<2x256xf32> -> vector<2x256xf32>
    %139 = vector.extract_strided_slice %138 {offsets = [0, 0], sizes = [2, 128], strides = [1, 1]} : vector<2x256xf32> to vector<2x128xf32>
    %140 = vector.broadcast %2 : vector<1x128xf32> to vector<2x128xf32>
    %141 = arith.addf %139, %140 : vector<2x128xf32>
    %142 = vector.extract_strided_slice %138 {offsets = [0, 128], sizes = [2, 128], strides = [1, 1]} : vector<2x256xf32> to vector<2x128xf32>
    %143 = arith.negf %141 : vector<2x128xf32>
    %144 = math.exp %143 : vector<2x128xf32>
    %cst_32 = arith.constant 1.000000e+00 : f32
    %145 = vector.broadcast %cst_32 : f32 to vector<2x128xf32>
    %146 = arith.addf %145, %144 : vector<2x128xf32>
    %147 = arith.divf %145, %146 : vector<2x128xf32>
    %148 = vector.extract_strided_slice %147 {offsets = [0, 0], sizes = [2, 32], strides = [1, 1]} : vector<2x128xf32> to vector<2x32xf32>
    %149 = vector.extract_strided_slice %147 {offsets = [0, 32], sizes = [2, 32], strides = [1, 1]} : vector<2x128xf32> to vector<2x32xf32>
    %150 = vector.extract_strided_slice %147 {offsets = [0, 64], sizes = [2, 32], strides = [1, 1]} : vector<2x128xf32> to vector<2x32xf32>
    %cst_33 = arith.constant 2.000000e+00 : f32
    %151 = vector.broadcast %cst_33 : f32 to vector<2x32xf32>
    %152 = arith.mulf %151, %150 : vector<2x32xf32>
    %cst_34 = arith.constant 1.000000e+00 : f32
    %153 = vector.broadcast %cst_34 : f32 to vector<2x32xf32>
    %154 = arith.subf %152, %153 : vector<2x32xf32>
    %155 = vector.extract_strided_slice %147 {offsets = [0, 96], sizes = [2, 32], strides = [1, 1]} : vector<2x128xf32> to vector<2x32xf32>
    %156 = arith.mulf %149, %107 : vector<2x32xf32>
    %157 = arith.mulf %148, %154 : vector<2x32xf32>
    %158 = arith.addf %156, %157 : vector<2x32xf32>
    %159 = math.tanh %158 : vector<2x32xf32>
    %160 = arith.mulf %155, %159 : vector<2x32xf32>
    %161 = tpu.concatenate %6, %160 in 1 : vector<2x32xf32>, vector<2x32xf32> -> vector<2x64xf32>
    %c0_35 = arith.constant 0 : index
    %c3 = arith.constant 3 : index
    %162 = vector.load %arg0[%c0_35, %c3] : memref<2x8xf32, #tpu.memory_space<vmem>>, vector<2x1xf32>
    %163 = vector.broadcast %162 : vector<2x1xf32> to vector<2x128xf32>
    %164 = vector.broadcast %0 : vector<1x128xf32> to vector<2x128xf32>
    %165 = arith.mulf %163, %164 : vector<2x128xf32>
    %166 = vector.broadcast %1 : vector<1x128xf32> to vector<2x128xf32>
    %167 = arith.addf %165, %166 : vector<2x128xf32>
    %168 = arith.addf %167, %142 : vector<2x128xf32>
    %169 = arith.negf %168 : vector<2x128xf32>
    %170 = math.exp %169 : vector<2x128xf32>
    %cst_36 = arith.constant 1.000000e+00 : f32
    %171 = vector.broadcast %cst_36 : f32 to vector<2x128xf32>
    %172 = arith.addf %171, %170 : vector<2x128xf32>
    %173 = arith.divf %171, %172 : vector<2x128xf32>
    %174 = vector.extract_strided_slice %173 {offsets = [0, 0], sizes = [2, 32], strides = [1, 1]} : vector<2x128xf32> to vector<2x32xf32>
    %175 = vector.extract_strided_slice %173 {offsets = [0, 32], sizes = [2, 32], strides = [1, 1]} : vector<2x128xf32> to vector<2x32xf32>
    %176 = vector.extract_strided_slice %173 {offsets = [0, 64], sizes = [2, 32], strides = [1, 1]} : vector<2x128xf32> to vector<2x32xf32>
    %cst_37 = arith.constant 2.000000e+00 : f32
    %177 = vector.broadcast %cst_37 : f32 to vector<2x32xf32>
    %178 = arith.mulf %177, %176 : vector<2x32xf32>
    %cst_38 = arith.constant 1.000000e+00 : f32
    %179 = vector.broadcast %cst_38 : f32 to vector<2x32xf32>
    %180 = arith.subf %178, %179 : vector<2x32xf32>
    %181 = vector.extract_strided_slice %173 {offsets = [0, 96], sizes = [2, 32], strides = [1, 1]} : vector<2x128xf32> to vector<2x32xf32>
    %182 = arith.mulf %175, %133 : vector<2x32xf32>
    %183 = arith.mulf %174, %180 : vector<2x32xf32>
    %184 = arith.addf %182, %183 : vector<2x32xf32>
    %185 = math.tanh %184 : vector<2x32xf32>
    %186 = arith.mulf %181, %185 : vector<2x32xf32>
    %187 = tpu.concatenate %186, %6 in 1 : vector<2x32xf32>, vector<2x32xf32> -> vector<2x64xf32>
    %188 = arith.addf %187, %161 : vector<2x64xf32>
    %cst_39 = arith.constant dense<0.000000e+00> : vector<2x256xf32>
    %189 = tpu.matmul %188, %4, %cst_39 {dimension_numbers = #tpu.dot_dimension_numbers<[1], [0], [0], [1], [0, 0, 1, 1], [], []>} : vector<2x64xf32>, vector<64x256xf32>, vector<2x256xf32> -> vector<2x256xf32>
    %190 = vector.extract_strided_slice %189 {offsets = [0, 0], sizes = [2, 128], strides = [1, 1]} : vector<2x256xf32> to vector<2x128xf32>
    %191 = vector.broadcast %2 : vector<1x128xf32> to vector<2x128xf32>
    %192 = arith.addf %190, %191 : vector<2x128xf32>
    %193 = vector.extract_strided_slice %189 {offsets = [0, 128], sizes = [2, 128], strides = [1, 1]} : vector<2x256xf32> to vector<2x128xf32>
    %194 = arith.negf %192 : vector<2x128xf32>
    %195 = math.exp %194 : vector<2x128xf32>
    %cst_40 = arith.constant 1.000000e+00 : f32
    %196 = vector.broadcast %cst_40 : f32 to vector<2x128xf32>
    %197 = arith.addf %196, %195 : vector<2x128xf32>
    %198 = arith.divf %196, %197 : vector<2x128xf32>
    %199 = vector.extract_strided_slice %198 {offsets = [0, 0], sizes = [2, 32], strides = [1, 1]} : vector<2x128xf32> to vector<2x32xf32>
    %200 = vector.extract_strided_slice %198 {offsets = [0, 32], sizes = [2, 32], strides = [1, 1]} : vector<2x128xf32> to vector<2x32xf32>
    %201 = vector.extract_strided_slice %198 {offsets = [0, 64], sizes = [2, 32], strides = [1, 1]} : vector<2x128xf32> to vector<2x32xf32>
    %cst_41 = arith.constant 2.000000e+00 : f32
    %202 = vector.broadcast %cst_41 : f32 to vector<2x32xf32>
    %203 = arith.mulf %202, %201 : vector<2x32xf32>
    %cst_42 = arith.constant 1.000000e+00 : f32
    %204 = vector.broadcast %cst_42 : f32 to vector<2x32xf32>
    %205 = arith.subf %203, %204 : vector<2x32xf32>
    %206 = vector.extract_strided_slice %198 {offsets = [0, 96], sizes = [2, 32], strides = [1, 1]} : vector<2x128xf32> to vector<2x32xf32>
    %207 = arith.mulf %200, %158 : vector<2x32xf32>
    %208 = arith.mulf %199, %205 : vector<2x32xf32>
    %209 = arith.addf %207, %208 : vector<2x32xf32>
    %210 = math.tanh %209 : vector<2x32xf32>
    %211 = arith.mulf %206, %210 : vector<2x32xf32>
    %212 = tpu.concatenate %6, %211 in 1 : vector<2x32xf32>, vector<2x32xf32> -> vector<2x64xf32>
    %c0_43 = arith.constant 0 : index
    %c4 = arith.constant 4 : index
    %213 = vector.load %arg0[%c0_43, %c4] : memref<2x8xf32, #tpu.memory_space<vmem>>, vector<2x1xf32>
    %214 = vector.broadcast %213 : vector<2x1xf32> to vector<2x128xf32>
    %215 = vector.broadcast %0 : vector<1x128xf32> to vector<2x128xf32>
    %216 = arith.mulf %214, %215 : vector<2x128xf32>
    %217 = vector.broadcast %1 : vector<1x128xf32> to vector<2x128xf32>
    %218 = arith.addf %216, %217 : vector<2x128xf32>
    %219 = arith.addf %218, %193 : vector<2x128xf32>
    %220 = arith.negf %219 : vector<2x128xf32>
    %221 = math.exp %220 : vector<2x128xf32>
    %cst_44 = arith.constant 1.000000e+00 : f32
    %222 = vector.broadcast %cst_44 : f32 to vector<2x128xf32>
    %223 = arith.addf %222, %221 : vector<2x128xf32>
    %224 = arith.divf %222, %223 : vector<2x128xf32>
    %225 = vector.extract_strided_slice %224 {offsets = [0, 0], sizes = [2, 32], strides = [1, 1]} : vector<2x128xf32> to vector<2x32xf32>
    %226 = vector.extract_strided_slice %224 {offsets = [0, 32], sizes = [2, 32], strides = [1, 1]} : vector<2x128xf32> to vector<2x32xf32>
    %227 = vector.extract_strided_slice %224 {offsets = [0, 64], sizes = [2, 32], strides = [1, 1]} : vector<2x128xf32> to vector<2x32xf32>
    %cst_45 = arith.constant 2.000000e+00 : f32
    %228 = vector.broadcast %cst_45 : f32 to vector<2x32xf32>
    %229 = arith.mulf %228, %227 : vector<2x32xf32>
    %cst_46 = arith.constant 1.000000e+00 : f32
    %230 = vector.broadcast %cst_46 : f32 to vector<2x32xf32>
    %231 = arith.subf %229, %230 : vector<2x32xf32>
    %232 = vector.extract_strided_slice %224 {offsets = [0, 96], sizes = [2, 32], strides = [1, 1]} : vector<2x128xf32> to vector<2x32xf32>
    %233 = arith.mulf %226, %184 : vector<2x32xf32>
    %234 = arith.mulf %225, %231 : vector<2x32xf32>
    %235 = arith.addf %233, %234 : vector<2x32xf32>
    %236 = math.tanh %235 : vector<2x32xf32>
    %237 = arith.mulf %232, %236 : vector<2x32xf32>
    %238 = tpu.concatenate %237, %6 in 1 : vector<2x32xf32>, vector<2x32xf32> -> vector<2x64xf32>
    %239 = arith.addf %238, %212 : vector<2x64xf32>
    %cst_47 = arith.constant dense<0.000000e+00> : vector<2x256xf32>
    %240 = tpu.matmul %239, %4, %cst_47 {dimension_numbers = #tpu.dot_dimension_numbers<[1], [0], [0], [1], [0, 0, 1, 1], [], []>} : vector<2x64xf32>, vector<64x256xf32>, vector<2x256xf32> -> vector<2x256xf32>
    %241 = vector.extract_strided_slice %240 {offsets = [0, 0], sizes = [2, 128], strides = [1, 1]} : vector<2x256xf32> to vector<2x128xf32>
    %242 = vector.broadcast %2 : vector<1x128xf32> to vector<2x128xf32>
    %243 = arith.addf %241, %242 : vector<2x128xf32>
    %244 = vector.extract_strided_slice %240 {offsets = [0, 128], sizes = [2, 128], strides = [1, 1]} : vector<2x256xf32> to vector<2x128xf32>
    %245 = arith.negf %243 : vector<2x128xf32>
    %246 = math.exp %245 : vector<2x128xf32>
    %cst_48 = arith.constant 1.000000e+00 : f32
    %247 = vector.broadcast %cst_48 : f32 to vector<2x128xf32>
    %248 = arith.addf %247, %246 : vector<2x128xf32>
    %249 = arith.divf %247, %248 : vector<2x128xf32>
    %250 = vector.extract_strided_slice %249 {offsets = [0, 0], sizes = [2, 32], strides = [1, 1]} : vector<2x128xf32> to vector<2x32xf32>
    %251 = vector.extract_strided_slice %249 {offsets = [0, 32], sizes = [2, 32], strides = [1, 1]} : vector<2x128xf32> to vector<2x32xf32>
    %252 = vector.extract_strided_slice %249 {offsets = [0, 64], sizes = [2, 32], strides = [1, 1]} : vector<2x128xf32> to vector<2x32xf32>
    %cst_49 = arith.constant 2.000000e+00 : f32
    %253 = vector.broadcast %cst_49 : f32 to vector<2x32xf32>
    %254 = arith.mulf %253, %252 : vector<2x32xf32>
    %cst_50 = arith.constant 1.000000e+00 : f32
    %255 = vector.broadcast %cst_50 : f32 to vector<2x32xf32>
    %256 = arith.subf %254, %255 : vector<2x32xf32>
    %257 = vector.extract_strided_slice %249 {offsets = [0, 96], sizes = [2, 32], strides = [1, 1]} : vector<2x128xf32> to vector<2x32xf32>
    %258 = arith.mulf %251, %209 : vector<2x32xf32>
    %259 = arith.mulf %250, %256 : vector<2x32xf32>
    %260 = arith.addf %258, %259 : vector<2x32xf32>
    %261 = math.tanh %260 : vector<2x32xf32>
    %262 = arith.mulf %257, %261 : vector<2x32xf32>
    %263 = tpu.concatenate %6, %262 in 1 : vector<2x32xf32>, vector<2x32xf32> -> vector<2x64xf32>
    %c0_51 = arith.constant 0 : index
    %c5 = arith.constant 5 : index
    %264 = vector.load %arg0[%c0_51, %c5] : memref<2x8xf32, #tpu.memory_space<vmem>>, vector<2x1xf32>
    %265 = vector.broadcast %264 : vector<2x1xf32> to vector<2x128xf32>
    %266 = vector.broadcast %0 : vector<1x128xf32> to vector<2x128xf32>
    %267 = arith.mulf %265, %266 : vector<2x128xf32>
    %268 = vector.broadcast %1 : vector<1x128xf32> to vector<2x128xf32>
    %269 = arith.addf %267, %268 : vector<2x128xf32>
    %270 = arith.addf %269, %244 : vector<2x128xf32>
    %271 = arith.negf %270 : vector<2x128xf32>
    %272 = math.exp %271 : vector<2x128xf32>
    %cst_52 = arith.constant 1.000000e+00 : f32
    %273 = vector.broadcast %cst_52 : f32 to vector<2x128xf32>
    %274 = arith.addf %273, %272 : vector<2x128xf32>
    %275 = arith.divf %273, %274 : vector<2x128xf32>
    %276 = vector.extract_strided_slice %275 {offsets = [0, 0], sizes = [2, 32], strides = [1, 1]} : vector<2x128xf32> to vector<2x32xf32>
    %277 = vector.extract_strided_slice %275 {offsets = [0, 32], sizes = [2, 32], strides = [1, 1]} : vector<2x128xf32> to vector<2x32xf32>
    %278 = vector.extract_strided_slice %275 {offsets = [0, 64], sizes = [2, 32], strides = [1, 1]} : vector<2x128xf32> to vector<2x32xf32>
    %cst_53 = arith.constant 2.000000e+00 : f32
    %279 = vector.broadcast %cst_53 : f32 to vector<2x32xf32>
    %280 = arith.mulf %279, %278 : vector<2x32xf32>
    %cst_54 = arith.constant 1.000000e+00 : f32
    %281 = vector.broadcast %cst_54 : f32 to vector<2x32xf32>
    %282 = arith.subf %280, %281 : vector<2x32xf32>
    %283 = vector.extract_strided_slice %275 {offsets = [0, 96], sizes = [2, 32], strides = [1, 1]} : vector<2x128xf32> to vector<2x32xf32>
    %284 = arith.mulf %277, %235 : vector<2x32xf32>
    %285 = arith.mulf %276, %282 : vector<2x32xf32>
    %286 = arith.addf %284, %285 : vector<2x32xf32>
    %287 = math.tanh %286 : vector<2x32xf32>
    %288 = arith.mulf %283, %287 : vector<2x32xf32>
    %289 = tpu.concatenate %288, %6 in 1 : vector<2x32xf32>, vector<2x32xf32> -> vector<2x64xf32>
    %290 = arith.addf %289, %263 : vector<2x64xf32>
    %cst_55 = arith.constant dense<0.000000e+00> : vector<2x256xf32>
    %291 = tpu.matmul %290, %4, %cst_55 {dimension_numbers = #tpu.dot_dimension_numbers<[1], [0], [0], [1], [0, 0, 1, 1], [], []>} : vector<2x64xf32>, vector<64x256xf32>, vector<2x256xf32> -> vector<2x256xf32>
    %292 = vector.extract_strided_slice %291 {offsets = [0, 0], sizes = [2, 128], strides = [1, 1]} : vector<2x256xf32> to vector<2x128xf32>
    %293 = vector.broadcast %2 : vector<1x128xf32> to vector<2x128xf32>
    %294 = arith.addf %292, %293 : vector<2x128xf32>
    %295 = vector.extract_strided_slice %291 {offsets = [0, 128], sizes = [2, 128], strides = [1, 1]} : vector<2x256xf32> to vector<2x128xf32>
    %296 = arith.negf %294 : vector<2x128xf32>
    %297 = math.exp %296 : vector<2x128xf32>
    %cst_56 = arith.constant 1.000000e+00 : f32
    %298 = vector.broadcast %cst_56 : f32 to vector<2x128xf32>
    %299 = arith.addf %298, %297 : vector<2x128xf32>
    %300 = arith.divf %298, %299 : vector<2x128xf32>
    %301 = vector.extract_strided_slice %300 {offsets = [0, 0], sizes = [2, 32], strides = [1, 1]} : vector<2x128xf32> to vector<2x32xf32>
    %302 = vector.extract_strided_slice %300 {offsets = [0, 32], sizes = [2, 32], strides = [1, 1]} : vector<2x128xf32> to vector<2x32xf32>
    %303 = vector.extract_strided_slice %300 {offsets = [0, 64], sizes = [2, 32], strides = [1, 1]} : vector<2x128xf32> to vector<2x32xf32>
    %cst_57 = arith.constant 2.000000e+00 : f32
    %304 = vector.broadcast %cst_57 : f32 to vector<2x32xf32>
    %305 = arith.mulf %304, %303 : vector<2x32xf32>
    %cst_58 = arith.constant 1.000000e+00 : f32
    %306 = vector.broadcast %cst_58 : f32 to vector<2x32xf32>
    %307 = arith.subf %305, %306 : vector<2x32xf32>
    %308 = vector.extract_strided_slice %300 {offsets = [0, 96], sizes = [2, 32], strides = [1, 1]} : vector<2x128xf32> to vector<2x32xf32>
    %309 = arith.mulf %302, %260 : vector<2x32xf32>
    %310 = arith.mulf %301, %307 : vector<2x32xf32>
    %311 = arith.addf %309, %310 : vector<2x32xf32>
    %312 = math.tanh %311 : vector<2x32xf32>
    %313 = arith.mulf %308, %312 : vector<2x32xf32>
    %314 = tpu.concatenate %6, %313 in 1 : vector<2x32xf32>, vector<2x32xf32> -> vector<2x64xf32>
    %c0_59 = arith.constant 0 : index
    %c6 = arith.constant 6 : index
    %315 = vector.load %arg0[%c0_59, %c6] : memref<2x8xf32, #tpu.memory_space<vmem>>, vector<2x1xf32>
    %316 = vector.broadcast %315 : vector<2x1xf32> to vector<2x128xf32>
    %317 = vector.broadcast %0 : vector<1x128xf32> to vector<2x128xf32>
    %318 = arith.mulf %316, %317 : vector<2x128xf32>
    %319 = vector.broadcast %1 : vector<1x128xf32> to vector<2x128xf32>
    %320 = arith.addf %318, %319 : vector<2x128xf32>
    %321 = arith.addf %320, %295 : vector<2x128xf32>
    %322 = arith.negf %321 : vector<2x128xf32>
    %323 = math.exp %322 : vector<2x128xf32>
    %cst_60 = arith.constant 1.000000e+00 : f32
    %324 = vector.broadcast %cst_60 : f32 to vector<2x128xf32>
    %325 = arith.addf %324, %323 : vector<2x128xf32>
    %326 = arith.divf %324, %325 : vector<2x128xf32>
    %327 = vector.extract_strided_slice %326 {offsets = [0, 0], sizes = [2, 32], strides = [1, 1]} : vector<2x128xf32> to vector<2x32xf32>
    %328 = vector.extract_strided_slice %326 {offsets = [0, 32], sizes = [2, 32], strides = [1, 1]} : vector<2x128xf32> to vector<2x32xf32>
    %329 = vector.extract_strided_slice %326 {offsets = [0, 64], sizes = [2, 32], strides = [1, 1]} : vector<2x128xf32> to vector<2x32xf32>
    %cst_61 = arith.constant 2.000000e+00 : f32
    %330 = vector.broadcast %cst_61 : f32 to vector<2x32xf32>
    %331 = arith.mulf %330, %329 : vector<2x32xf32>
    %cst_62 = arith.constant 1.000000e+00 : f32
    %332 = vector.broadcast %cst_62 : f32 to vector<2x32xf32>
    %333 = arith.subf %331, %332 : vector<2x32xf32>
    %334 = vector.extract_strided_slice %326 {offsets = [0, 96], sizes = [2, 32], strides = [1, 1]} : vector<2x128xf32> to vector<2x32xf32>
    %335 = arith.mulf %328, %286 : vector<2x32xf32>
    %336 = arith.mulf %327, %333 : vector<2x32xf32>
    %337 = arith.addf %335, %336 : vector<2x32xf32>
    %338 = math.tanh %337 : vector<2x32xf32>
    %339 = arith.mulf %334, %338 : vector<2x32xf32>
    %340 = tpu.concatenate %339, %6 in 1 : vector<2x32xf32>, vector<2x32xf32> -> vector<2x64xf32>
    %341 = arith.addf %340, %314 : vector<2x64xf32>
    %cst_63 = arith.constant dense<0.000000e+00> : vector<2x256xf32>
    %342 = tpu.matmul %341, %4, %cst_63 {dimension_numbers = #tpu.dot_dimension_numbers<[1], [0], [0], [1], [0, 0, 1, 1], [], []>} : vector<2x64xf32>, vector<64x256xf32>, vector<2x256xf32> -> vector<2x256xf32>
    %343 = vector.extract_strided_slice %342 {offsets = [0, 0], sizes = [2, 128], strides = [1, 1]} : vector<2x256xf32> to vector<2x128xf32>
    %344 = vector.broadcast %2 : vector<1x128xf32> to vector<2x128xf32>
    %345 = arith.addf %343, %344 : vector<2x128xf32>
    %346 = vector.extract_strided_slice %342 {offsets = [0, 128], sizes = [2, 128], strides = [1, 1]} : vector<2x256xf32> to vector<2x128xf32>
    %347 = arith.negf %345 : vector<2x128xf32>
    %348 = math.exp %347 : vector<2x128xf32>
    %cst_64 = arith.constant 1.000000e+00 : f32
    %349 = vector.broadcast %cst_64 : f32 to vector<2x128xf32>
    %350 = arith.addf %349, %348 : vector<2x128xf32>
    %351 = arith.divf %349, %350 : vector<2x128xf32>
    %352 = vector.extract_strided_slice %351 {offsets = [0, 0], sizes = [2, 32], strides = [1, 1]} : vector<2x128xf32> to vector<2x32xf32>
    %353 = vector.extract_strided_slice %351 {offsets = [0, 32], sizes = [2, 32], strides = [1, 1]} : vector<2x128xf32> to vector<2x32xf32>
    %354 = vector.extract_strided_slice %351 {offsets = [0, 64], sizes = [2, 32], strides = [1, 1]} : vector<2x128xf32> to vector<2x32xf32>
    %cst_65 = arith.constant 2.000000e+00 : f32
    %355 = vector.broadcast %cst_65 : f32 to vector<2x32xf32>
    %356 = arith.mulf %355, %354 : vector<2x32xf32>
    %cst_66 = arith.constant 1.000000e+00 : f32
    %357 = vector.broadcast %cst_66 : f32 to vector<2x32xf32>
    %358 = arith.subf %356, %357 : vector<2x32xf32>
    %359 = vector.extract_strided_slice %351 {offsets = [0, 96], sizes = [2, 32], strides = [1, 1]} : vector<2x128xf32> to vector<2x32xf32>
    %360 = arith.mulf %353, %311 : vector<2x32xf32>
    %361 = arith.mulf %352, %358 : vector<2x32xf32>
    %362 = arith.addf %360, %361 : vector<2x32xf32>
    %363 = math.tanh %362 : vector<2x32xf32>
    %364 = arith.mulf %359, %363 : vector<2x32xf32>
    %365 = tpu.concatenate %6, %364 in 1 : vector<2x32xf32>, vector<2x32xf32> -> vector<2x64xf32>
    %c0_67 = arith.constant 0 : index
    %c7 = arith.constant 7 : index
    %366 = vector.load %arg0[%c0_67, %c7] : memref<2x8xf32, #tpu.memory_space<vmem>>, vector<2x1xf32>
    %367 = vector.broadcast %366 : vector<2x1xf32> to vector<2x128xf32>
    %368 = vector.broadcast %0 : vector<1x128xf32> to vector<2x128xf32>
    %369 = arith.mulf %367, %368 : vector<2x128xf32>
    %370 = vector.broadcast %1 : vector<1x128xf32> to vector<2x128xf32>
    %371 = arith.addf %369, %370 : vector<2x128xf32>
    %372 = arith.addf %371, %346 : vector<2x128xf32>
    %373 = arith.negf %372 : vector<2x128xf32>
    %374 = math.exp %373 : vector<2x128xf32>
    %cst_68 = arith.constant 1.000000e+00 : f32
    %375 = vector.broadcast %cst_68 : f32 to vector<2x128xf32>
    %376 = arith.addf %375, %374 : vector<2x128xf32>
    %377 = arith.divf %375, %376 : vector<2x128xf32>
    %378 = vector.extract_strided_slice %377 {offsets = [0, 0], sizes = [2, 32], strides = [1, 1]} : vector<2x128xf32> to vector<2x32xf32>
    %379 = vector.extract_strided_slice %377 {offsets = [0, 32], sizes = [2, 32], strides = [1, 1]} : vector<2x128xf32> to vector<2x32xf32>
    %380 = vector.extract_strided_slice %377 {offsets = [0, 64], sizes = [2, 32], strides = [1, 1]} : vector<2x128xf32> to vector<2x32xf32>
    %cst_69 = arith.constant 2.000000e+00 : f32
    %381 = vector.broadcast %cst_69 : f32 to vector<2x32xf32>
    %382 = arith.mulf %381, %380 : vector<2x32xf32>
    %cst_70 = arith.constant 1.000000e+00 : f32
    %383 = vector.broadcast %cst_70 : f32 to vector<2x32xf32>
    %384 = arith.subf %382, %383 : vector<2x32xf32>
    %385 = vector.extract_strided_slice %377 {offsets = [0, 96], sizes = [2, 32], strides = [1, 1]} : vector<2x128xf32> to vector<2x32xf32>
    %386 = arith.mulf %379, %337 : vector<2x32xf32>
    %387 = arith.mulf %378, %384 : vector<2x32xf32>
    %388 = arith.addf %386, %387 : vector<2x32xf32>
    %389 = math.tanh %388 : vector<2x32xf32>
    %390 = arith.mulf %385, %389 : vector<2x32xf32>
    %391 = tpu.concatenate %390, %6 in 1 : vector<2x32xf32>, vector<2x32xf32> -> vector<2x64xf32>
    %392 = arith.addf %391, %365 : vector<2x64xf32>
    %cst_71 = arith.constant dense<0.000000e+00> : vector<2x256xf32>
    %393 = tpu.matmul %392, %4, %cst_71 {dimension_numbers = #tpu.dot_dimension_numbers<[1], [0], [0], [1], [0, 0, 1, 1], [], []>} : vector<2x64xf32>, vector<64x256xf32>, vector<2x256xf32> -> vector<2x256xf32>
    %394 = vector.extract_strided_slice %393 {offsets = [0, 0], sizes = [2, 128], strides = [1, 1]} : vector<2x256xf32> to vector<2x128xf32>
    %395 = vector.broadcast %2 : vector<1x128xf32> to vector<2x128xf32>
    %396 = arith.addf %394, %395 : vector<2x128xf32>
    %397 = arith.negf %396 : vector<2x128xf32>
    %398 = math.exp %397 : vector<2x128xf32>
    %cst_72 = arith.constant 1.000000e+00 : f32
    %399 = vector.broadcast %cst_72 : f32 to vector<2x128xf32>
    %400 = arith.addf %399, %398 : vector<2x128xf32>
    %401 = arith.divf %399, %400 : vector<2x128xf32>
    %402 = vector.extract_strided_slice %401 {offsets = [0, 0], sizes = [2, 32], strides = [1, 1]} : vector<2x128xf32> to vector<2x32xf32>
    %403 = vector.extract_strided_slice %401 {offsets = [0, 32], sizes = [2, 32], strides = [1, 1]} : vector<2x128xf32> to vector<2x32xf32>
    %404 = vector.extract_strided_slice %401 {offsets = [0, 64], sizes = [2, 32], strides = [1, 1]} : vector<2x128xf32> to vector<2x32xf32>
    %cst_73 = arith.constant 2.000000e+00 : f32
    %405 = vector.broadcast %cst_73 : f32 to vector<2x32xf32>
    %406 = arith.mulf %405, %404 : vector<2x32xf32>
    %cst_74 = arith.constant 1.000000e+00 : f32
    %407 = vector.broadcast %cst_74 : f32 to vector<2x32xf32>
    %408 = arith.subf %406, %407 : vector<2x32xf32>
    %409 = vector.extract_strided_slice %401 {offsets = [0, 96], sizes = [2, 32], strides = [1, 1]} : vector<2x128xf32> to vector<2x32xf32>
    %410 = arith.mulf %403, %362 : vector<2x32xf32>
    %411 = arith.mulf %402, %408 : vector<2x32xf32>
    %412 = arith.addf %410, %411 : vector<2x32xf32>
    %413 = math.tanh %412 : vector<2x32xf32>
    %414 = arith.mulf %409, %413 : vector<2x32xf32>
    %cst_75 = arith.constant dense<0.000000e+00> : vector<2x128xf32>
    %415 = tpu.matmul %414, %5, %cst_75 {dimension_numbers = #tpu.dot_dimension_numbers<[1], [0], [0], [1], [0, 0, 1, 1], [], []>} : vector<2x32xf32>, vector<32x128xf32>, vector<2x128xf32> -> vector<2x128xf32>
    %416 = vector.broadcast %3 : vector<1x128xf32> to vector<2x128xf32>
    %417 = arith.addf %415, %416 : vector<2x128xf32>
    %c0_76 = arith.constant 0 : index
    %c0_77 = arith.constant 0 : index
    %418 = vector.load %arg2[%c0_76, %c0_77] : memref<2x128xf32, #tpu.memory_space<vmem>>, vector<2x128xf32>
    tpu.vector_store %arg2[%c0_76, %c0_77], %417 {strides = array<i32>} : memref<2x128xf32, #tpu.memory_space<vmem>>, vector<2x128xf32>,
    return
  }
}

</mosaic_0001>

<bundles_post_ra>
// kernel: char_predictor_forward.1
= control target key start
LH: loop header
LB: loop body
LE: loop exit
PB: predicated region body
PF: predicated region fallthrough
CT: control target
= control target key end

     0   :  { %7 = vsyncpa [#allocation3], 0  ;;  %s1932_s0 = inlined_call_operand.hbm [shape: f32[2,8], index: 0, kind: input, shape index: {}]   ;;  %s1933_s1 = inlined_call_operand.hbm [shape: f32[104,256], index: 1, kind: input, shape index: {}]   ;;  %s1934_s2 = inlined_call_operand.hbm [shape: f32[2,128], index: 2, kind: output, shape index: {}]  }
   0x1   :  { %8 = vsyncpa [#allocation6], 0 }
   0x2   :  { %9 = vsyncpa [#allocation4], 0  ;;  %s1543_s9 = smov [#allocation2]   ;;  %s1544_s11 = smov [#allocation5]  }
   0x3   :  { %s16_s10 = sshll.u32 %s1543_s9, 4  ;;  %s25_s12 = sshll.u32 %s1544_s11, 4  ;;  %s17_s10 = int_to_ptr.vmem [resolvable:$true] %s16_s10  ;;  %s26_s12 = int_to_ptr.vmem [resolvable:$true] %s25_s12 }
   0x4   :  { %s1485_s13 = scalar_lea.vmem %s17_s10, 32  ;;  %p1490_p1 = scmp.lt.s32.totalorder %s17_s10, %s17_s10 }
   0x5   :  { %p1486_p0 = scmp.ne.s32.totalorder %s17_s10, %s1485_s13  ;;  %p1491_p2 = scmp.lt.s32.totalorder %s1485_s13, %s1485_s13 }
   0x7   :  { %p1492_p3 = por %p1491_p2, %p1490_p1 }
   0x9   :  { %p1493_p4 = pnand %p1492_p3, %p1486_p0 }
   0xb   :  { %1496 = shalt.err (!%p1493_p4)
}
   0xc   :  { %19 = dma.hbm_to_vmem [thread:$0]  %s1932_s0, 32, %s17_s10, [#allocation3]  }
   0xd   :  { %s1505_s16 = scalar_lea.vmem %s26_s12, 3328  ;;  %p1510_p6 = scmp.lt.s32.totalorder %s26_s12, %s26_s12 }
   0xe   :  { %p1506_p5 = scmp.ne.s32.totalorder %s26_s12, %s1505_s16  ;;  %p1511_p7 = scmp.lt.s32.totalorder %s1505_s16, %s1505_s16 }
  0x10   :  { %p1512_p8 = por %p1511_p7, %p1510_p6 }
  0x12   :  { %p1513_p9 = pnand %p1512_p8, %p1506_p5 }
  0x14   :  { %1516 = shalt.err (!%p1513_p9)
}
  0x15   :  { %s1545_s17 = smov 256   ;;  %s1546_s18 = smov 16  }
  0x16   :  { %31 = dma.hbm_to_vmem [thread:$0]  %s1933_s1, 3328, %s26_s12, [#allocation6], %s1545_s17, %s1545_s17, %s1546_s18  }
  0x17   :  { %1537 = dma.done.wait [#allocation3], 32  }
  0x18   :  { %1538 = vsyncadd [#allocation3], 4294967264 }
  0x19   :  { %1539 = dma.done.wait [#allocation6], 3328  }
  0x1a   :  { %1540 = vsyncadd [#allocation6], 4294963968  ;;  %v1547_v0 = vmov 0   ;;  %v1581_v1 = vld [vmem:[#allocation2] sm:$0x3]  ;;  %s1548_s0 = smov 64  }
  0x1b   :  { %1370 = vset.pattern.permute.xlu0 %v1547_v0  ;;  %v1584_v2 = vld [vmem:[#allocation5] ss:$0 sm:$0xff]  ;;  %v1586_v4 = vld [vmem:[#allocation5 + $0x8] ss:$0 sm:$0xff]  ;;  %s1549_s1 = smov 32   ;;  %v1604_v20 = vld [vmem:[#allocation5 + $0x78] sm:$0xff] }
  0x1c   :  { %65 = vperm.xlu0 %1370, %v1581_v1   ;;  %v1600_v18 = vld [vmem:[#allocation5 + $0x88] sm:$0xff]  ;;  %v1602_v19 = vld [vmem:[#allocation5 + $0x80] sm:$0xff]  ;;  %v1607_v21 = vld [vmem:[#allocation5 + $0x70] sm:$0xff]  ;;  %v1550_v35 = vmov 0.0   ;;  %v1551_v36 = vmov 1   ;;  %vm100_vm0 = vcmask 261120  }
  0x1d   :  { %123 = vmatprep.subr.mxu0 %v1600_v18  ;;  %266 = vmatprep.subr.mxu1 %v1600_v18  ;;  %v1611_v22 = vld [vmem:[#allocation5 + $0x68] sm:$0xff]  ;;  %v1615_v23 = vld [vmem:[#allocation5 + $0x60] sm:$0xff]  ;;  %v1619_v24 = vld [vmem:[#allocation5 + $0x58] sm:$0xff]  ;;  %vm103_vm1 = vcmask 523264   ;;  %vm1558_vm2 = vmmov 0   ;;  %s1559_s21 = smov [#allocation7]  }
  0x1e   :  { %124 = vmatpush1.msra.mxu0 %v1602_v19  ;;  %267 = vmatpush1.msra.mxu1 %v1602_v19  ;;  %v1623_v25 = vld [vmem:[#allocation5 + $0x50] sm:$0xff]  ;;  %v1627_v26 = vld [vmem:[#allocation5 + $0x48] sm:$0xff]  ;;  %v1631_v27 = vld [vmem:[#allocation5 + $0x40] sm:$0xff]  ;;  %s1286_s22 = sshll.u32 %s1559_s21, 4  ;;  %s1287_s22 = int_to_ptr.vmem [resolvable:$true] %s1286_s22 }
  0x1f   :  { %125 = vmatprep.subr.mxu0 %v1604_v20  ;;  %268 = vmatprep.subr.mxu1 %v1604_v20  ;;  %v1635_v28 = vld [vmem:[#allocation5 + $0x38] sm:$0xff]  ;;  %v1639_v29 = vld [vmem:[#allocation5 + $0x30] sm:$0xff]  ;;  %v1643_v31 = vld [vmem:[#allocation5 + $0x28] sm:$0xff]  ;;  %s1517_s23 = scalar_lea.vmem %s1287_s22, 32  ;;  %p1522_p11 = scmp.lt.s32.totalorder %s1287_s22, %s1287_s22 }
  0x20   :  { %126 = vmatpush1.msra.mxu0 %v1607_v21  ;;  %269 = vmatpush1.msra.mxu1 %v1607_v21  ;;  %v1648_v32 = vld [vmem:[#allocation5 + $0x20] sm:$0xff]  ;;  %v1651_v33 = vld [vmem:[#allocation5 + $0x18] sm:$0xff]  ;;  %v1661_v34 = vld [vmem:[#allocation5 + $0x10] sm:$0xff]  ;;  %p1518_p10 = scmp.ne.s32.totalorder %s1287_s22, %s1517_s23  ;;  %p1523_p12 = scmp.lt.s32.totalorder %s1517_s23, %s1517_s23 }
  0x21   :  { %127 = vmatprep.subr.mxu0 %v1611_v22  ;;  %270 = vmatprep.subr.mxu1 %v1611_v22  ;;  %v1692_v43 = vld [vmem:[#allocation5 + $0x1] ss:$0 sm:$0xff] }
  0x22   :  { %128 = vmatpush1.msra.mxu0 %v1615_v23  ;;  %271 = vmatpush1.msra.mxu1 %v1615_v23  ;;  %p1524_p13 = por %p1523_p12, %p1522_p11 }
  0x23   :  { %129 = vmatprep.subr.mxu0 %v1619_v24  ;;  %272 = vmatprep.subr.mxu1 %v1619_v24 }
  0x24   :  { %130 = vmatpush1.msra.mxu0 %v1623_v25  ;;  %273 = vmatpush1.msra.mxu1 %v1623_v25  ;;  %p1525_p0 = pnand %p1524_p13, %p1518_p10 }
  0x25   :  { %131 = vmatprep.subr.mxu0 %v1627_v26  ;;  %274 = vmatprep.subr.mxu1 %v1627_v26 }
  0x26   :  { %132 = vmatpush1.msra.mxu0 %v1631_v27  ;;  %275 = vmatpush1.msra.mxu1 %v1631_v27 }
  0x27   :  { %133 = vmatprep.subr.mxu0 %v1635_v28  ;;  %276 = vmatprep.subr.mxu1 %v1635_v28 }
  0x28   :  { %134 = vmatpush1.msra.mxu0 %v1639_v29  ;;  %277 = vmatpush1.msra.mxu1 %v1639_v29 }
  0x29   :  { %135 = vmatprep.subr.mxu0 %v1643_v31  ;;  %278 = vmatprep.subr.mxu1 %v1643_v31 }
  0x2a   :  { %136 = vmatpush1.msra.mxu0 %v1648_v32  ;;  %279 = vmatpush1.msra.mxu1 %v1648_v32 }
  0x2b   :  { %137 = vmatprep.subr.mxu0 %v1651_v33  ;;  %280 = vmatprep.subr.mxu1 %v1651_v33 }
  0x2c   :  { %138 = vmatpush1.msra.mxu0 %v1661_v34  ;;  %171 = vmatprep.mubr.f32.mxu0 %v1550_v35 }
  0x2d   :  { %281 = vmatpush1.msra.mxu1 %v1661_v34  ;;  %314 = vmatprep.mubr.f32.mxu1 %v1550_v35 }
  0x2e   :  { %1371 = vset.pattern.permute.xlu1 %v1551_v36  ;;  %409 = vmatprep.subr.mxu0 %v1600_v18 }
  0x2f   :  { %552 = vmatprep.subr.mxu1 %v1600_v18 }
  0x97   :  { %v66_v3 = vpop.permute.xlu0 %65 }
  0x98   :  { %v68_v5 = vmul.f32 %v66_v3, %v1584_v2 }
  0x9a   :  { %v69_v6 = vadd.f32 %v68_v5, %v1586_v4 }
  0x9c   :  { %v1296_v7 = vmul.f32 -1.442695, %v69_v6 }
  0x9e   :  { %1378 = vpow2.f32 %v1296_v7 }
  0xab   :  { %v1379_v8 = vpop.eup %1378 }
  0xac   :  { %v74_v9 = vadd.f32 1.0, %v1379_v8 }
  0xae   :  { %1380 = vrcp.f32 %v74_v9 }
  0xbb   :  { %v1590_v10 = vpop.eup %1380 }
  0xbc   :  { %v77_v11 = vmul.f32 2.0, %v1590_v10  ;;  %v79_v15 = vmul.f32 0.0, %v1590_v10 }
  0xbe   :  { %v1297_v12 = vadd.f32 -1.0, %v77_v11 }
  0xc0   :  { %81 = vrot.lane.b32.xlu0 %v1297_v12, %s1548_s0  ;;  %v1552_v12 = vmov 2  }
  0xc1   :  { %1372 = vset.pattern.permute.xlu0 %v1552_v12  ;;  %v1553_v12 = vmov 3  }
 0x132   :  { %v82_v13 = vpop.permute.xlu0 %81 }
 0x133   :  { %v84_v14 = vmul.f32 %v1590_v10, %v82_v13 }
 0x135   :  { %86 = vrot.lane.b32.xlu1 %v84_v14, %s1549_s1 }
 0x1a7   :  { %v87_v16 = vpop.permute.xlu1 %86 }
 0x1a8   :  { %v1597_v17 = vadd.f32 %v87_v16, %v79_v15 }
 0x1aa   :  { %1382 = vtanh.f32 %v1597_v17 }
 0x1b7   :  { %v1383_v30 = vpop.eup %1382 }
 0x1b8   :  { %92 = vrot.lane.b32.xlu1 %v1383_v30, %s1548_s0 }
 0x1bc   :  { %210 = vperm.xlu1 %1371, %v1581_v1  }
 0x22a   :  { %v93_v37 = vpop.permute.xlu1 %92 }
 0x22b   :  { %v95_v38 = vmul.f32 %v1590_v10, %v93_v37 }
 0x22d   :  { %97 = vrot.lane.b32.xlu0 %v95_v38, %s1549_s1 }
 0x237   :  { %v211_v41 = vpop.permute.xlu1 %210 }
 0x238   :  { %v213_v42 = vmul.f32 %v211_v41, %v1584_v2 }
 0x23a   :  { %v214_v44 = vadd.f32 %v213_v42, %v1586_v4 }
 0x29f   :  { %v98_v39 = vpop.permute.xlu0 %97 }
 0x2a0   :  { %v101_v40 = vsel %vm100_vm0, %v98_v39, 0.0 }
 0x2a1   :  { %1298 = vmatmul.mubr.msk.f32.vlgmr.msra.gmra.mxu0 %vm103_vm1, %v101_v40 }
 0x2a2   :  { %410 = vmatpush1.msra.mxu0 %v1602_v19  ;;  %457 = vmatprep.mubr.f32.mxu0 %v1550_v35 }
 0x2a3   :  { %411 = vmatprep.subr.mxu0 %v1604_v20 }
 0x2a4   :  { %412 = vmatpush1.msra.mxu0 %v1607_v21 }
 0x2a5   :  { %413 = vmatprep.subr.mxu0 %v1611_v22 }
 0x2a6   :  { %414 = vmatpush1.msra.mxu0 %v1615_v23 }
 0x2a7   :  { %415 = vmatprep.subr.mxu0 %v1619_v24 }
 0x2a8   :  { %416 = vmatpush1.msra.mxu0 %v1623_v25 }
 0x2a9   :  { %417 = vmatprep.subr.mxu0 %v1627_v26 }
 0x2aa   :  { %418 = vmatpush1.msra.mxu0 %v1631_v27 }
 0x2ab   :  { %419 = vmatprep.subr.mxu0 %v1635_v28 }
 0x2ac   :  { %420 = vmatpush1.msra.mxu0 %v1639_v29 }
 0x2ad   :  { %421 = vmatprep.subr.mxu0 %v1643_v31 }
 0x2ae   :  { %422 = vmatpush1.msra.mxu0 %v1648_v32 }
 0x2af   :  { %423 = vmatprep.subr.mxu0 %v1651_v33 }
 0x2b0   :  { %424 = vmatpush1.msra.mxu0 %v1661_v34 }
 0x2b1   :  { %695 = vmatprep.subr.mxu0 %v1600_v18 }
 0x361   :  { %v173_v45 = vpop.f32.mrf.mxu0 }
 0x362   :  { %v178_v46 = vadd.f32 %v173_v45, %v1692_v43 }
 0x363   :  { %v175_v47 = vpop.f32.mrf.mxu0 }
 0x364   :  { %v1299_v48 = vmul.f32 -1.442695, %v178_v46  ;;  %v215_v49 = vadd.f32 %v214_v44, %v175_v47 }
 0x366   :  { %1384 = vpow2.f32 %v1299_v48  ;;  %v1301_v50 = vmul.f32 -1.442695, %v215_v49 }
 0x368   :  { %1386 = vpow2.f32 %v1301_v50 }
 0x373   :  { %v1385_v51 = vpop.eup %1384 }
 0x374   :  { %v182_v52 = vadd.f32 1.0, %v1385_v51 }
 0x375   :  { %v1387_v53 = vpop.eup %1386 }
 0x376   :  { %1388 = vrcp.f32 %v182_v52  ;;  %v219_v54 = vadd.f32 1.0, %v1387_v53 }
 0x378   :  { %1390 = vrcp.f32 %v219_v54 }
 0x383   :  { %v1389_v55 = vpop.eup %1388 }
 0x384   :  { %v185_v56 = vmul.f32 2.0, %v1389_v55  ;;  %v187_v3 = vmul.f32 0.0, %v1389_v55 }
 0x385   :  { %v1391_v57 = vpop.eup %1390 }
 0x386   :  { %v1300_v58 = vadd.f32 -1.0, %v185_v56  ;;  %v222_v59 = vmul.f32 2.0, %v1391_v57  ;;  %v224_v7 = vmul.f32 %v1391_v57, %v1597_v17 }
 0x388   :  { %189 = vrot.lane.b32.xlu0 %v1300_v58, %s1548_s0  ;;  %v1302_v60 = vadd.f32 -1.0, %v222_v59 }
 0x38a   :  { %226 = vrot.lane.b32.xlu1 %v1302_v60, %s1548_s0 }
 0x3fa   :  { %v190_v61 = vpop.permute.xlu0 %189 }
 0x3fb   :  { %v192_v62 = vmul.f32 %v1389_v55, %v190_v61 }
 0x3fc   :  { %v227_v63 = vpop.permute.xlu1 %226 }
 0x3fd   :  { %v229_v0 = vmul.f32 %v1391_v57, %v227_v63  ;;  %194 = vrot.lane.b32.xlu0 %v192_v62, %s1549_s1 }
 0x3ff   :  { %231 = vrot.lane.b32.xlu1 %v229_v0, %s1549_s1 }
 0x46f   :  { %v195_v5 = vpop.permute.xlu0 %194 }
 0x470   :  { %v1700_v6 = vadd.f32 %v195_v5, %v187_v3 }
 0x471   :  { %v232_v8 = vpop.permute.xlu1 %231 }
 0x472   :  { %1392 = vtanh.f32 %v1700_v6  ;;  %v1704_v9 = vadd.f32 %v232_v8, %v224_v7 }
 0x474   :  { %1394 = vtanh.f32 %v1704_v9 }
 0x47f   :  { %v1393_v10 = vpop.eup %1392 }
 0x480   :  { %200 = vrot.lane.b32.xlu0 %v1393_v10, %s1548_s0 }
 0x481   :  { %v1395_v11 = vpop.eup %1394 }
 0x482   :  { %237 = vrot.lane.b32.xlu1 %v1395_v11, %s1548_s0 }
 0x4f2   :  { %v201_v13 = vpop.permute.xlu0 %200 }
 0x4f3   :  { %v203_v14 = vmul.f32 %v1389_v55, %v201_v13 }
 0x4f4   :  { %v238_v15 = vpop.permute.xlu1 %237 }
 0x4f5   :  { %v240_v16 = vmul.f32 %v1391_v57, %v238_v15  ;;  %205 = vrot.lane.b32.xlu0 %v203_v14, %s1548_s0 }
 0x4f7   :  { %242 = vrot.lane.b32.xlu1 %v240_v16, %s1549_s1 }
 0x4f9   :  { %353 = vperm.xlu0 %1372, %v1581_v1  }
 0x4fd   :  { %1373 = vset.pattern.permute.xlu0 %v1553_v12  ;;  %v1554_v12 = vmov 4  }
 0x567   :  { %v206_v17 = vpop.permute.xlu0 %205 }
 0x568   :  { %v208_v36 = vsel %vm100_vm0, 0.0, %v206_v17 }
 0x569   :  { %v243_v30 = vpop.permute.xlu1 %242 }
 0x56a   :  { %v245_v37 = vsel %vm100_vm0, %v243_v30, 0.0 }
 0x56b   :  { %v246_v38 = vadd.f32 %v245_v37, %v208_v36 }
 0x56d   :  { %1303 = vmatmul.mubr.msk.f32.vlgmr.msra.gmra.mxu1 %vm103_vm1, %v246_v38 }
 0x56e   :  { %553 = vmatpush1.msra.mxu1 %v1602_v19  ;;  %600 = vmatprep.mubr.f32.mxu1 %v1550_v35 }
 0x56f   :  { %554 = vmatprep.subr.mxu1 %v1604_v20 }
 0x570   :  { %555 = vmatpush1.msra.mxu1 %v1607_v21 }
 0x571   :  { %556 = vmatprep.subr.mxu1 %v1611_v22 }
 0x572   :  { %557 = vmatpush1.msra.mxu1 %v1615_v23 }
 0x573   :  { %558 = vmatprep.subr.mxu1 %v1619_v24 }
 0x574   :  { %559 = vmatpush1.msra.mxu1 %v1623_v25  ;;  %v354_v39 = vpop.permute.xlu0 %353 }
 0x575   :  { %560 = vmatprep.subr.mxu1 %v1627_v26  ;;  %v356_v40 = vmul.f32 %v354_v39, %v1584_v2 }
 0x576   :  { %561 = vmatpush1.msra.mxu1 %v1631_v27 }
 0x577   :  { %562 = vmatprep.subr.mxu1 %v1635_v28  ;;  %v357_v41 = vadd.f32 %v356_v40, %v1586_v4 }
 0x578   :  { %563 = vmatpush1.msra.mxu1 %v1639_v29 }
 0x579   :  { %564 = vmatprep.subr.mxu1 %v1643_v31 }
 0x57a   :  { %565 = vmatpush1.msra.mxu1 %v1648_v32 }
 0x57b   :  { %566 = vmatprep.subr.mxu1 %v1651_v33 }
 0x57c   :  { %567 = vmatpush1.msra.mxu1 %v1661_v34 }
 0x57d   :  { %838 = vmatprep.subr.mxu1 %v1600_v18 }
 0x62d   :  { %v316_v42 = vpop.f32.mrf.mxu1 }
 0x62e   :  { %v321_v44 = vadd.f32 %v316_v42, %v1692_v43 }
 0x62f   :  { %v318_v45 = vpop.f32.mrf.mxu1 }
 0x630   :  { %v1304_v46 = vmul.f32 -1.442695, %v321_v44  ;;  %v358_v47 = vadd.f32 %v357_v41, %v318_v45 }
 0x632   :  { %1396 = vpow2.f32 %v1304_v46  ;;  %v1306_v48 = vmul.f32 -1.442695, %v358_v47 }
 0x634   :  { %1398 = vpow2.f32 %v1306_v48 }
 0x63f   :  { %v1397_v49 = vpop.eup %1396 }
 0x640   :  { %v325_v50 = vadd.f32 1.0, %v1397_v49 }
 0x641   :  { %v1399_v51 = vpop.eup %1398 }
 0x642   :  { %1400 = vrcp.f32 %v325_v50  ;;  %v362_v52 = vadd.f32 1.0, %v1399_v51 }
 0x644   :  { %1402 = vrcp.f32 %v362_v52 }
 0x64f   :  { %v1401_v53 = vpop.eup %1400 }
 0x650   :  { %v328_v54 = vmul.f32 2.0, %v1401_v53  ;;  %v330_v63 = vmul.f32 %v1401_v53, %v1700_v6 }
 0x651   :  { %v1403_v55 = vpop.eup %1402 }
 0x652   :  { %v1305_v56 = vadd.f32 -1.0, %v328_v54  ;;  %v365_v57 = vmul.f32 2.0, %v1403_v55  ;;  %v367_v5 = vmul.f32 %v1403_v55, %v1704_v9 }
 0x654   :  { %332 = vrot.lane.b32.xlu1 %v1305_v56, %s1548_s0  ;;  %v1307_v58 = vadd.f32 -1.0, %v365_v57 }
 0x658   :  { %369 = vrot.lane.b32.xlu1 %v1307_v58, %s1548_s0 }
 0x6c6   :  { %v333_v59 = vpop.permute.xlu1 %332 }
 0x6c7   :  { %v335_v60 = vmul.f32 %v1401_v53, %v333_v59 }
 0x6c9   :  { %337 = vrot.lane.b32.xlu0 %v335_v60, %s1549_s1 }
 0x6ca   :  { %v370_v61 = vpop.permute.xlu1 %369 }
 0x6cb   :  { %v372_v62 = vmul.f32 %v1403_v55, %v370_v61 }
 0x6cd   :  { %374 = vrot.lane.b32.xlu1 %v372_v62, %s1549_s1 }
 0x73b   :  { %v338_v0 = vpop.permute.xlu0 %337 }
 0x73c   :  { %v1740_v3 = vadd.f32 %v338_v0, %v330_v63 }
 0x73e   :  { %1404 = vtanh.f32 %v1740_v3 }
 0x73f   :  { %v375_v7 = vpop.permute.xlu1 %374 }
 0x740   :  { %v1744_v8 = vadd.f32 %v375_v7, %v367_v5 }
 0x742   :  { %1406 = vtanh.f32 %v1744_v8 }
 0x74b   :  { %v1405_v10 = vpop.eup %1404 }
 0x74c   :  { %343 = vrot.lane.b32.xlu0 %v1405_v10, %s1548_s0 }
 0x74f   :  { %v1407_v11 = vpop.eup %1406 }
 0x750   :  { %380 = vrot.lane.b32.xlu1 %v1407_v11, %s1548_s0 }
 0x7be   :  { %v344_v6 = vpop.permute.xlu0 %343 }
 0x7bf   :  { %v346_v13 = vmul.f32 %v1401_v53, %v344_v6 }
 0x7c1   :  { %348 = vrot.lane.b32.xlu0 %v346_v13, %s1548_s0 }
 0x7c2   :  { %v381_v14 = vpop.permute.xlu1 %380 }
 0x7c3   :  { %v383_v15 = vmul.f32 %v1403_v55, %v381_v14 }
 0x7c5   :  { %385 = vrot.lane.b32.xlu1 %v383_v15, %s1549_s1  ;;  %496 = vperm.xlu0 %1373, %v1581_v1  }
 0x7c9   :  { %1374 = vset.pattern.permute.xlu0 %v1554_v12 }
 0x833   :  { %v349_v9 = vpop.permute.xlu0 %348 }
 0x834   :  { %v351_v17 = vsel %vm100_vm0, 0.0, %v349_v9 }
 0x837   :  { %v386_v16 = vpop.permute.xlu1 %385 }
 0x838   :  { %v388_v30 = vsel %vm100_vm0, %v386_v16, 0.0 }
 0x839   :  { %v389_v36 = vadd.f32 %v388_v30, %v351_v17 }
 0x83b   :  { %1308 = vmatmul.mubr.msk.f32.vlgmr.msra.gmra.mxu0 %vm103_vm1, %v389_v36 }
 0x83c   :  { %696 = vmatpush1.msra.mxu0 %v1602_v19  ;;  %743 = vmatprep.mubr.f32.mxu0 %v1550_v35 }
 0x83d   :  { %697 = vmatprep.subr.mxu0 %v1604_v20 }
 0x83e   :  { %698 = vmatpush1.msra.mxu0 %v1607_v21 }
 0x83f   :  { %699 = vmatprep.subr.mxu0 %v1611_v22 }
 0x840   :  { %700 = vmatpush1.msra.mxu0 %v1615_v23  ;;  %v497_v37 = vpop.permute.xlu0 %496 }
 0x841   :  { %701 = vmatprep.subr.mxu0 %v1619_v24  ;;  %v499_v38 = vmul.f32 %v497_v37, %v1584_v2 }
 0x842   :  { %702 = vmatpush1.msra.mxu0 %v1623_v25 }
 0x843   :  { %703 = vmatprep.subr.mxu0 %v1627_v26  ;;  %v500_v39 = vadd.f32 %v499_v38, %v1586_v4 }
 0x844   :  { %704 = vmatpush1.msra.mxu0 %v1631_v27 }
 0x845   :  { %705 = vmatprep.subr.mxu0 %v1635_v28 }
 0x846   :  { %706 = vmatpush1.msra.mxu0 %v1639_v29 }
 0x847   :  { %707 = vmatprep.subr.mxu0 %v1643_v31 }
 0x848   :  { %708 = vmatpush1.msra.mxu0 %v1648_v32 }
 0x849   :  { %709 = vmatprep.subr.mxu0 %v1651_v33 }
 0x84a   :  { %710 = vmatpush1.msra.mxu0 %v1661_v34 }
 0x84b   :  { %981 = vmatprep.subr.mxu0 %v1600_v18 }
 0x8fb   :  { %v459_v40 = vpop.f32.mrf.mxu0 }
 0x8fc   :  { %v464_v41 = vadd.f32 %v459_v40, %v1692_v43 }
 0x8fd   :  { %v461_v42 = vpop.f32.mrf.mxu0 }
 0x8fe   :  { %v1309_v44 = vmul.f32 -1.442695, %v464_v41  ;;  %v501_v45 = vadd.f32 %v500_v39, %v461_v42 }
 0x900   :  { %1408 = vpow2.f32 %v1309_v44  ;;  %v1311_v46 = vmul.f32 -1.442695, %v501_v45 }
 0x902   :  { %1410 = vpow2.f32 %v1311_v46 }
 0x90d   :  { %v1409_v47 = vpop.eup %1408 }
 0x90e   :  { %v468_v48 = vadd.f32 1.0, %v1409_v47 }
 0x90f   :  { %v1411_v49 = vpop.eup %1410 }
 0x910   :  { %1412 = vrcp.f32 %v468_v48  ;;  %v505_v50 = vadd.f32 1.0, %v1411_v49 }
 0x912   :  { %1414 = vrcp.f32 %v505_v50 }
 0x91d   :  { %v1413_v51 = vpop.eup %1412 }
 0x91e   :  { %v471_v52 = vmul.f32 2.0, %v1413_v51  ;;  %v473_v61 = vmul.f32 %v1413_v51, %v1740_v3 }
 0x91f   :  { %v1415_v53 = vpop.eup %1414 }
 0x920   :  { %v1310_v54 = vadd.f32 -1.0, %v471_v52  ;;  %v508_v55 = vmul.f32 2.0, %v1415_v53  ;;  %v510_v0 = vmul.f32 %v1415_v53, %v1744_v8 }
 0x922   :  { %475 = vrot.lane.b32.xlu1 %v1310_v54, %s1548_s0  ;;  %v1312_v56 = vadd.f32 -1.0, %v508_v55 }
 0x926   :  { %512 = vrot.lane.b32.xlu1 %v1312_v56, %s1548_s0 }
 0x994   :  { %v476_v57 = vpop.permute.xlu1 %475 }
 0x995   :  { %v478_v58 = vmul.f32 %v1413_v51, %v476_v57 }
 0x997   :  { %480 = vrot.lane.b32.xlu0 %v478_v58, %s1549_s1 }
 0x998   :  { %v513_v59 = vpop.permute.xlu1 %512 }
 0x999   :  { %v515_v60 = vmul.f32 %v1415_v53, %v513_v59 }
 0x99b   :  { %517 = vrot.lane.b32.xlu1 %v515_v60, %s1549_s1 }
 0xa09   :  { %v481_v62 = vpop.permute.xlu0 %480 }
 0xa0a   :  { %v1780_v63 = vadd.f32 %v481_v62, %v473_v61 }
 0xa0c   :  { %1416 = vtanh.f32 %v1780_v63 }
 0xa0d   :  { %v518_v5 = vpop.permute.xlu1 %517 }
 0xa0e   :  { %v1784_v7 = vadd.f32 %v518_v5, %v510_v0 }
 0xa10   :  { %1418 = vtanh.f32 %v1784_v7 }
 0xa19   :  { %v1417_v10 = vpop.eup %1416 }
 0xa1a   :  { %486 = vrot.lane.b32.xlu0 %v1417_v10, %s1548_s0 }
 0xa1d   :  { %v1419_v11 = vpop.eup %1418 }
 0xa1e   :  { %523 = vrot.lane.b32.xlu1 %v1419_v11, %s1548_s0  ;;  %v1555_v11 = vmov 5  }
 0xa8c   :  { %v487_v3 = vpop.permute.xlu0 %486 }
 0xa8d   :  { %v489_v6 = vmul.f32 %v1413_v51, %v487_v3 }
 0xa8f   :  { %491 = vrot.lane.b32.xlu0 %v489_v6, %s1548_s0 }
 0xa90   :  { %v524_v13 = vpop.permute.xlu1 %523 }
 0xa91   :  { %v526_v14 = vmul.f32 %v1415_v53, %v524_v13 }
 0xa93   :  { %528 = vrot.lane.b32.xlu1 %v526_v14, %s1549_s1  ;;  %639 = vperm.xlu0 %1374, %v1581_v1  }
 0xa97   :  { %1375 = vset.pattern.permute.xlu0 %v1555_v11 }
 0xb01   :  { %v492_v8 = vpop.permute.xlu0 %491 }
 0xb02   :  { %v494_v9 = vsel %vm100_vm0, 0.0, %v492_v8 }
 0xb05   :  { %v529_v15 = vpop.permute.xlu1 %528 }
 0xb06   :  { %v531_v16 = vsel %vm100_vm0, %v529_v15, 0.0 }
 0xb07   :  { %v532_v17 = vadd.f32 %v531_v16, %v494_v9 }
 0xb09   :  { %1313 = vmatmul.mubr.msk.f32.vlgmr.msra.gmra.mxu1 %vm103_vm1, %v532_v17 }
 0xb0a   :  { %839 = vmatpush1.msra.mxu1 %v1602_v19  ;;  %886 = vmatprep.mubr.f32.mxu1 %v1550_v35 }
 0xb0b   :  { %840 = vmatprep.subr.mxu1 %v1604_v20 }
 0xb0c   :  { %841 = vmatpush1.msra.mxu1 %v1607_v21 }
 0xb0d   :  { %842 = vmatprep.subr.mxu1 %v1611_v22 }
 0xb0e   :  { %843 = vmatpush1.msra.mxu1 %v1615_v23  ;;  %v640_v30 = vpop.permute.xlu0 %639 }
 0xb0f   :  { %844 = vmatprep.subr.mxu1 %v1619_v24  ;;  %v642_v36 = vmul.f32 %v640_v30, %v1584_v2 }
 0xb10   :  { %845 = vmatpush1.msra.mxu1 %v1623_v25 }
 0xb11   :  { %846 = vmatprep.subr.mxu1 %v1627_v26  ;;  %v643_v37 = vadd.f32 %v642_v36, %v1586_v4 }
 0xb12   :  { %847 = vmatpush1.msra.mxu1 %v1631_v27 }
 0xb13   :  { %848 = vmatprep.subr.mxu1 %v1635_v28 }
 0xb14   :  { %849 = vmatpush1.msra.mxu1 %v1639_v29 }
 0xb15   :  { %850 = vmatprep.subr.mxu1 %v1643_v31 }
 0xb16   :  { %851 = vmatpush1.msra.mxu1 %v1648_v32 }
 0xb17   :  { %852 = vmatprep.subr.mxu1 %v1651_v33 }
 0xb18   :  { %853 = vmatpush1.msra.mxu1 %v1661_v34 }
 0xb19   :  { %1124 = vmatprep.subr.mxu1 %v1600_v18 }
 0xbc9   :  { %v602_v38 = vpop.f32.mrf.mxu1 }
 0xbca   :  { %v607_v39 = vadd.f32 %v602_v38, %v1692_v43 }
 0xbcb   :  { %v604_v40 = vpop.f32.mrf.mxu1 }
 0xbcc   :  { %v1314_v41 = vmul.f32 -1.442695, %v607_v39  ;;  %v644_v42 = vadd.f32 %v643_v37, %v604_v40 }
 0xbce   :  { %1420 = vpow2.f32 %v1314_v41  ;;  %v1316_v44 = vmul.f32 -1.442695, %v644_v42 }
 0xbd0   :  { %1422 = vpow2.f32 %v1316_v44 }
 0xbdb   :  { %v1421_v45 = vpop.eup %1420 }
 0xbdc   :  { %v611_v46 = vadd.f32 1.0, %v1421_v45 }
 0xbdd   :  { %v1423_v47 = vpop.eup %1422 }
 0xbde   :  { %1424 = vrcp.f32 %v611_v46  ;;  %v648_v48 = vadd.f32 1.0, %v1423_v47 }
 0xbe0   :  { %1426 = vrcp.f32 %v648_v48 }
 0xbeb   :  { %v1425_v18 = vpop.eup %1424 }
 0xbec   :  { %v614_v49 = vmul.f32 2.0, %v1425_v18  ;;  %v616_v58 = vmul.f32 %v1425_v18, %v1780_v63 }
 0xbed   :  { %v1427_v50 = vpop.eup %1426 }
 0xbee   :  { %v1315_v51 = vadd.f32 -1.0, %v614_v49  ;;  %v651_v52 = vmul.f32 2.0, %v1427_v50  ;;  %v653_v61 = vmul.f32 %v1427_v50, %v1784_v7 }
 0xbf0   :  { %618 = vrot.lane.b32.xlu1 %v1315_v51, %s1548_s0  ;;  %v1317_v53 = vadd.f32 -1.0, %v651_v52 }
 0xbf4   :  { %655 = vrot.lane.b32.xlu1 %v1317_v53, %s1548_s0 }
 0xc62   :  { %v619_v54 = vpop.permute.xlu1 %618 }
 0xc63   :  { %v621_v55 = vmul.f32 %v1425_v18, %v619_v54 }
 0xc65   :  { %623 = vrot.lane.b32.xlu0 %v621_v55, %s1549_s1 }
 0xc66   :  { %v656_v56 = vpop.permute.xlu1 %655 }
 0xc67   :  { %v658_v57 = vmul.f32 %v1427_v50, %v656_v56 }
 0xc69   :  { %660 = vrot.lane.b32.xlu1 %v658_v57, %s1549_s1 }
 0xcd7   :  { %v624_v59 = vpop.permute.xlu0 %623 }
 0xcd8   :  { %v1820_v60 = vadd.f32 %v624_v59, %v616_v58 }
 0xcda   :  { %1428 = vtanh.f32 %v1820_v60 }
 0xcdb   :  { %v661_v62 = vpop.permute.xlu1 %660 }
 0xcdc   :  { %v1824_v0 = vadd.f32 %v661_v62, %v653_v61 }
 0xcde   :  { %1430 = vtanh.f32 %v1824_v0 }
 0xce7   :  { %v1429_v5 = vpop.eup %1428 }
 0xce8   :  { %629 = vrot.lane.b32.xlu0 %v1429_v5, %s1548_s0 }
 0xceb   :  { %v1431_v10 = vpop.eup %1430 }
 0xcec   :  { %666 = vrot.lane.b32.xlu1 %v1431_v10, %s1548_s0  ;;  %v1556_v10 = vmov 6  }
 0xd5a   :  { %v630_v63 = vpop.permute.xlu0 %629 }
 0xd5b   :  { %v632_v12 = vmul.f32 %v1425_v18, %v630_v63 }
 0xd5d   :  { %634 = vrot.lane.b32.xlu0 %v632_v12, %s1548_s0 }
 0xd5e   :  { %v667_v3 = vpop.permute.xlu1 %666 }
 0xd5f   :  { %v669_v6 = vmul.f32 %v1427_v50, %v667_v3 }
 0xd61   :  { %671 = vrot.lane.b32.xlu1 %v669_v6, %s1549_s1  ;;  %782 = vperm.xlu0 %1375, %v1581_v1  }
 0xd65   :  { %1376 = vset.pattern.permute.xlu0 %v1556_v10 }
 0xdcf   :  { %v635_v7 = vpop.permute.xlu0 %634 }
 0xdd0   :  { %v637_v14 = vsel %vm100_vm0, 0.0, %v635_v7 }
 0xdd3   :  { %v672_v13 = vpop.permute.xlu1 %671 }
 0xdd4   :  { %v674_v8 = vsel %vm100_vm0, %v672_v13, 0.0 }
 0xdd5   :  { %v675_v15 = vadd.f32 %v674_v8, %v637_v14 }
 0xdd7   :  { %1318 = vmatmul.mubr.msk.f32.vlgmr.msra.gmra.mxu0 %vm103_vm1, %v675_v15 }
 0xdd8   :  { %982 = vmatpush1.msra.mxu0 %v1602_v19  ;;  %1029 = vmatprep.mubr.f32.mxu0 %v1550_v35 }
 0xdd9   :  { %983 = vmatprep.subr.mxu0 %v1604_v20 }
 0xdda   :  { %984 = vmatpush1.msra.mxu0 %v1607_v21 }
 0xddb   :  { %985 = vmatprep.subr.mxu0 %v1611_v22 }
 0xddc   :  { %986 = vmatpush1.msra.mxu0 %v1615_v23  ;;  %v783_v9 = vpop.permute.xlu0 %782 }
 0xddd   :  { %987 = vmatprep.subr.mxu0 %v1619_v24  ;;  %v785_v16 = vmul.f32 %v783_v9, %v1584_v2 }
 0xdde   :  { %988 = vmatpush1.msra.mxu0 %v1623_v25 }
 0xddf   :  { %989 = vmatprep.subr.mxu0 %v1627_v26  ;;  %v786_v17 = vadd.f32 %v785_v16, %v1586_v4 }
 0xde0   :  { %990 = vmatpush1.msra.mxu0 %v1631_v27 }
 0xde1   :  { %991 = vmatprep.subr.mxu0 %v1635_v28 }
 0xde2   :  { %992 = vmatpush1.msra.mxu0 %v1639_v29 }
 0xde3   :  { %993 = vmatprep.subr.mxu0 %v1643_v31 }
 0xde4   :  { %994 = vmatpush1.msra.mxu0 %v1648_v32 }
 0xde5   :  { %995 = vmatprep.subr.mxu0 %v1651_v33 }
 0xde6   :  { %996 = vmatpush1.msra.mxu0 %v1661_v34 }
 0xde7   :  { %1342 = vmatprep.subr.mxu0 %v1550_v35 }
 0xe97   :  { %v745_v30 = vpop.f32.mrf.mxu0 }
 0xe98   :  { %v750_v36 = vadd.f32 %v745_v30, %v1692_v43 }
 0xe99   :  { %v747_v37 = vpop.f32.mrf.mxu0 }
 0xe9a   :  { %v1319_v38 = vmul.f32 -1.442695, %v750_v36  ;;  %v787_v39 = vadd.f32 %v786_v17, %v747_v37 }
 0xe9c   :  { %1432 = vpow2.f32 %v1319_v38  ;;  %v1321_v40 = vmul.f32 -1.442695, %v787_v39 }
 0xe9e   :  { %1434 = vpow2.f32 %v1321_v40 }
 0xea9   :  { %v1433_v41 = vpop.eup %1432 }
 0xeaa   :  { %v754_v42 = vadd.f32 1.0, %v1433_v41 }
 0xeab   :  { %v1435_v44 = vpop.eup %1434 }
 0xeac   :  { %1436 = vrcp.f32 %v754_v42  ;;  %v791_v45 = vadd.f32 1.0, %v1435_v44  ;;  %v1557_v42 = vmov 7  }
 0xeae   :  { %1438 = vrcp.f32 %v791_v45 }
 0xeb9   :  { %v1437_v46 = vpop.eup %1436 }
 0xeba   :  { %v757_v47 = vmul.f32 2.0, %v1437_v46  ;;  %v759_v55 = vmul.f32 %v1437_v46, %v1820_v60 }
 0xebb   :  { %v1439_v48 = vpop.eup %1438 }
 0xebc   :  { %v1320_v18 = vadd.f32 -1.0, %v757_v47  ;;  %v794_v49 = vmul.f32 2.0, %v1439_v48  ;;  %v796_v58 = vmul.f32 %v1439_v48, %v1824_v0 }
 0xebe   :  { %761 = vrot.lane.b32.xlu1 %v1320_v18, %s1548_s0  ;;  %v1322_v50 = vadd.f32 -1.0, %v794_v49 }
 0xec2   :  { %798 = vrot.lane.b32.xlu1 %v1322_v50, %s1548_s0 }
 0xf30   :  { %v762_v51 = vpop.permute.xlu1 %761 }
 0xf31   :  { %v764_v52 = vmul.f32 %v1437_v46, %v762_v51 }
 0xf33   :  { %766 = vrot.lane.b32.xlu0 %v764_v52, %s1549_s1 }
 0xf34   :  { %v799_v53 = vpop.permute.xlu1 %798 }
 0xf35   :  { %v801_v54 = vmul.f32 %v1439_v48, %v799_v53 }
 0xf37   :  { %803 = vrot.lane.b32.xlu1 %v801_v54, %s1549_s1  ;;  %v1475_v54 = vld [vmem:[#allocation5] ss:$0 sm:$0xff] }
 0xfa5   :  { %v767_v56 = vpop.permute.xlu0 %766 }
 0xfa6   :  { %v1860_v57 = vadd.f32 %v767_v56, %v759_v55  ;;  %v1476_v56 = vld [vmem:[#allocation5 + $0x8] ss:$0 sm:$0xff] }
 0xfa8   :  { %1440 = vtanh.f32 %v1860_v57 }
 0xfa9   :  { %v804_v59 = vpop.permute.xlu1 %803 }
 0xfaa   :  { %v1864_v61 = vadd.f32 %v804_v59, %v796_v58 }
 0xfac   :  { %1442 = vtanh.f32 %v1864_v61 }
 0xfb5   :  { %v1441_v62 = vpop.eup %1440 }
 0xfb6   :  { %772 = vrot.lane.b32.xlu0 %v1441_v62, %s1548_s0 }
 0xfb9   :  { %v1443_v5 = vpop.eup %1442 }
 0xfba   :  { %809 = vrot.lane.b32.xlu1 %v1443_v5, %s1548_s0 }
0x1028   :  { %v773_v60 = vpop.permute.xlu0 %772 }
0x1029   :  { %v775_v11 = vmul.f32 %v1437_v46, %v773_v60 }
0x102b   :  { %777 = vrot.lane.b32.xlu0 %v775_v11, %s1548_s0 }
0x102c   :  { %v810_v63 = vpop.permute.xlu1 %809 }
0x102d   :  { %v812_v12 = vmul.f32 %v1439_v48, %v810_v63  ;;  %v1474_v48 = vld [vmem:[#allocation2] sm:$0x3] }
0x102f   :  { %814 = vrot.lane.b32.xlu1 %v812_v12, %s1549_s1  ;;  %925 = vperm.xlu0 %1376, %v1581_v1  }
0x1033   :  { %1377 = vset.pattern.permute.xlu0 %v1557_v42 }
0x109d   :  { %v778_v0 = vpop.permute.xlu0 %777 }
0x109e   :  { %v780_v6 = vsel %vm100_vm0, 0.0, %v778_v0 }
0x10a1   :  { %v815_v3 = vpop.permute.xlu1 %814 }
0x10a2   :  { %v817_v7 = vsel %vm100_vm0, %v815_v3, 0.0 }
0x10a3   :  { %v818_v13 = vadd.f32 %v817_v7, %v780_v6 }
0x10a5   :  { %1323 = vmatmul.mubr.msk.f32.vlgmr.msra.gmra.mxu1 %vm103_vm1, %v818_v13 }
0x10a6   :  { %1125 = vmatpush1.msra.mxu1 %v1602_v19  ;;  %1172 = vmatprep.mubr.f32.mxu1 %v1550_v35 }
0x10a7   :  { %1126 = vmatprep.subr.mxu1 %v1604_v20 }
0x10a8   :  { %1127 = vmatpush1.msra.mxu1 %v1607_v21 }
0x10a9   :  { %1128 = vmatprep.subr.mxu1 %v1611_v22 }
0x10aa   :  { %1129 = vmatpush1.msra.mxu1 %v1615_v23  ;;  %v926_v1 = vpop.permute.xlu0 %925 }
0x10ab   :  { %1130 = vmatprep.subr.mxu1 %v1619_v24  ;;  %v928_v19 = vmul.f32 %v926_v1, %v1584_v2 }
0x10ac   :  { %1131 = vmatpush1.msra.mxu1 %v1623_v25 }
0x10ad   :  { %1132 = vmatprep.subr.mxu1 %v1627_v26  ;;  %v929_v20 = vadd.f32 %v928_v19, %v1586_v4 }
0x10ae   :  { %1133 = vmatpush1.msra.mxu1 %v1631_v27 }
0x10af   :  { %1134 = vmatprep.subr.mxu1 %v1635_v28 }
0x10b0   :  { %1135 = vmatpush1.msra.mxu1 %v1639_v29 }
0x10b1   :  { %1136 = vmatprep.subr.mxu1 %v1643_v31 }
0x10b2   :  { %1137 = vmatpush1.msra.mxu1 %v1648_v32 }
0x10b3   :  { %1138 = vmatprep.subr.mxu1 %v1651_v33 }
0x10b4   :  { %1139 = vmatpush1.msra.mxu1 %v1661_v34 }
0x1165   :  { %v888_v21 = vpop.f32.mrf.mxu1 }
0x1166   :  { %v893_v22 = vadd.f32 %v888_v21, %v1692_v43 }
0x1167   :  { %v890_v23 = vpop.f32.mrf.mxu1 }
0x1168   :  { %v1324_v24 = vmul.f32 -1.442695, %v893_v22  ;;  %v930_v25 = vadd.f32 %v929_v20, %v890_v23 }
0x116a   :  { %1444 = vpow2.f32 %v1324_v24  ;;  %v1326_v26 = vmul.f32 -1.442695, %v930_v25 }
0x116c   :  { %1446 = vpow2.f32 %v1326_v26 }
0x1177   :  { %v1445_v27 = vpop.eup %1444 }
0x1178   :  { %v897_v28 = vadd.f32 1.0, %v1445_v27 }
0x1179   :  { %v1447_v29 = vpop.eup %1446 }
0x117a   :  { %1448 = vrcp.f32 %v897_v28  ;;  %v934_v31 = vadd.f32 1.0, %v1447_v29 }
0x117c   :  { %1450 = vrcp.f32 %v934_v31 }
0x1187   :  { %v1449_v32 = vpop.eup %1448 }
0x1188   :  { %v900_v33 = vmul.f32 2.0, %v1449_v32  ;;  %v902_v17 = vmul.f32 %v1449_v32, %v1860_v57 }
0x1189   :  { %v1451_v2 = vpop.eup %1450 }
0x118a   :  { %v1325_v34 = vadd.f32 -1.0, %v900_v33  ;;  %v937_v4 = vmul.f32 2.0, %v1451_v2  ;;  %v939_v37 = vmul.f32 %v1451_v2, %v1864_v61 }
0x118c   :  { %904 = vrot.lane.b32.xlu1 %v1325_v34, %s1548_s0  ;;  %v1327_v14 = vadd.f32 -1.0, %v937_v4 }
0x1190   :  { %941 = vrot.lane.b32.xlu1 %v1327_v14, %s1548_s0 }
0x11fe   :  { %v905_v8 = vpop.permute.xlu1 %904 }
0x11ff   :  { %v907_v15 = vmul.f32 %v1449_v32, %v905_v8 }
0x1201   :  { %909 = vrot.lane.b32.xlu0 %v907_v15, %s1549_s1 }
0x1202   :  { %v942_v9 = vpop.permute.xlu1 %941 }
0x1203   :  { %v944_v16 = vmul.f32 %v1451_v2, %v942_v9 }
0x1205   :  { %946 = vrot.lane.b32.xlu1 %v944_v16, %s1549_s1 }
0x1273   :  { %v910_v30 = vpop.permute.xlu0 %909 }
0x1274   :  { %v912_v36 = vadd.f32 %v910_v30, %v902_v17 }
0x1276   :  { %1452 = vtanh.f32 %v912_v36 }
0x1277   :  { %v947_v38 = vpop.permute.xlu1 %946 }
0x1278   :  { %v949_v39 = vadd.f32 %v947_v38, %v939_v37 }
0x127a   :  { %1454 = vtanh.f32 %v949_v39 }
0x1283   :  { %v1453_v40 = vpop.eup %1452 }
0x1284   :  { %915 = vrot.lane.b32.xlu0 %v1453_v40, %s1548_s0 }
0x1287   :  { %v1455_v41 = vpop.eup %1454 }
0x1288   :  { %952 = vrot.lane.b32.xlu1 %v1455_v41, %s1548_s0 }
0x12f6   :  { %v916_v44 = vpop.permute.xlu0 %915 }
0x12f7   :  { %v918_v45 = vmul.f32 %v1449_v32, %v916_v44 }
0x12f9   :  { %920 = vrot.lane.b32.xlu0 %v918_v45, %s1548_s0 }
0x12fa   :  { %v953_v46 = vpop.permute.xlu1 %952 }
0x12fb   :  { %v955_v47 = vmul.f32 %v1451_v2, %v953_v46 }
0x12fd   :  { %957 = vrot.lane.b32.xlu1 %v955_v47, %s1549_s1  ;;  %1068 = vperm.xlu0 %1377, %v1474_v48   ;;  %v60_v48 = vld [vmem:[#allocation5 + $0xb0] sm:$0xff] }
0x136b   :  { %v921_v18 = vpop.permute.xlu0 %920 }
0x136c   :  { %v923_v50 = vsel %vm100_vm0, 0.0, %v921_v18  ;;  %v59_v18 = vld [vmem:[#allocation5 + $0xa0] sm:$0xff] }
0x136f   :  { %v958_v49 = vpop.permute.xlu1 %957 }
0x1370   :  { %v960_v51 = vsel %vm100_vm0, %v958_v49, 0.0  ;;  %v58_v49 = vld [vmem:[#allocation5 + $0x90] sm:$0xff] }
0x1371   :  { %v961_v52 = vadd.f32 %v960_v51, %v923_v50 }
0x1373   :  { %1328 = vmatmul.mubr.msk.f32.vlgmr.msra.gmra.mxu0 %vm103_vm1, %v961_v52 }
0x1374   :  { %1350 = vmatprep.mubr.msk.f32.mxu0 %vm1558_vm2, %v1550_v35 }
0x1378   :  { %v1069_v53 = vpop.permute.xlu0 %1068 }
0x1379   :  { %v1071_v55 = vmul.f32 %v1475_v54, %v1069_v53  ;;  %v41_v54 = vld [vmem:[#allocation5 + $0x9] ss:$0 sm:$0xff] }
0x137b   :  { %v1072_v57 = vadd.f32 %v1476_v56, %v1071_v55 }
0x1433   :  { %v1031_v58 = vpop.f32.mrf.mxu0 }
0x1434   :  { %v1036_v59 = vadd.f32 %v1031_v58, %v1692_v43 }
0x1435   :  { %v1033_v61 = vpop.f32.mrf.mxu0 }
0x1436   :  { %v1329_v62 = vmul.f32 -1.442695, %v1036_v59  ;;  %v1073_v5 = vadd.f32 %v1072_v57, %v1033_v61 }
0x1438   :  { %1456 = vpow2.f32 %v1329_v62  ;;  %v1331_v10 = vmul.f32 -1.442695, %v1073_v5 }
0x143a   :  { %1458 = vpow2.f32 %v1331_v10 }
0x1445   :  { %v1457_v60 = vpop.eup %1456 }
0x1446   :  { %v1040_v11 = vadd.f32 1.0, %v1457_v60 }
0x1447   :  { %v1459_v63 = vpop.eup %1458 }
0x1448   :  { %1460 = vrcp.f32 %v1040_v11  ;;  %v1077_v12 = vadd.f32 1.0, %v1459_v63 }
0x144a   :  { %1462 = vrcp.f32 %v1077_v12 }
0x1455   :  { %v1461_v0 = vpop.eup %1460 }
0x1456   :  { %v1043_v3 = vmul.f32 2.0, %v1461_v0  ;;  %v1045_v23 = vmul.f32 %v1461_v0, %v912_v36 }
0x1457   :  { %v1463_v6 = vpop.eup %1462 }
0x1458   :  { %v1330_v7 = vadd.f32 -1.0, %v1043_v3  ;;  %v1080_v13 = vmul.f32 2.0, %v1463_v6  ;;  %v1082_v26 = vmul.f32 %v1463_v6, %v949_v39 }
0x145a   :  { %1047 = vrot.lane.b32.xlu1 %v1330_v7, %s1548_s0  ;;  %v1332_v1 = vadd.f32 -1.0, %v1080_v13 }
0x145e   :  { %1084 = vrot.lane.b32.xlu1 %v1332_v1, %s1548_s0 }
0x14cc   :  { %v1048_v19 = vpop.permute.xlu1 %1047 }
0x14cd   :  { %v1050_v20 = vmul.f32 %v1461_v0, %v1048_v19 }
0x14cf   :  { %1052 = vrot.lane.b32.xlu0 %v1050_v20, %s1549_s1 }
0x14d0   :  { %v1085_v21 = vpop.permute.xlu1 %1084 }
0x14d1   :  { %v1087_v22 = vmul.f32 %v1463_v6, %v1085_v21 }
0x14d3   :  { %1089 = vrot.lane.b32.xlu1 %v1087_v22, %s1549_s1 }
0x1541   :  { %v1053_v24 = vpop.permute.xlu0 %1052 }
0x1542   :  { %v1055_v25 = vadd.f32 %v1053_v24, %v1045_v23 }
0x1544   :  { %1464 = vtanh.f32 %v1055_v25 }
0x1545   :  { %v1090_v27 = vpop.permute.xlu1 %1089 }
0x1546   :  { %v1092_v28 = vadd.f32 %v1090_v27, %v1082_v26 }
0x1548   :  { %1466 = vtanh.f32 %v1092_v28 }
0x1551   :  { %v1465_v29 = vpop.eup %1464 }
0x1552   :  { %1058 = vrot.lane.b32.xlu0 %v1465_v29, %s1548_s0 }
0x1555   :  { %v1467_v31 = vpop.eup %1466 }
0x1556   :  { %1095 = vrot.lane.b32.xlu1 %v1467_v31, %s1548_s0 }
0x15c4   :  { %v1059_v32 = vpop.permute.xlu0 %1058 }
0x15c5   :  { %v1061_v33 = vmul.f32 %v1461_v0, %v1059_v32 }
0x15c7   :  { %1063 = vrot.lane.b32.xlu0 %v1061_v33, %s1548_s0 }
0x15c8   :  { %v1096_v2 = vpop.permute.xlu1 %1095 }
0x15c9   :  { %v1098_v34 = vmul.f32 %v1463_v6, %v1096_v2 }
0x15cb   :  { %1100 = vrot.lane.b32.xlu1 %v1098_v34, %s1549_s1 }
0x1639   :  { %v1064_v4 = vpop.permute.xlu0 %1063 }
0x163a   :  { %v1066_v8 = vsel %vm100_vm0, 0.0, %v1064_v4 }
0x163d   :  { %v1101_v14 = vpop.permute.xlu1 %1100 }
0x163e   :  { %v1103_v15 = vsel %vm100_vm0, %v1101_v14, 0.0 }
0x163f   :  { %v1104_v9 = vadd.f32 %v1103_v15, %v1066_v8 }
0x1641   :  { %1333 = vmatmul.mubr.msk.f32.vlgmr.msra.gmra.mxu1 %vm103_vm1, %v1104_v9 }
0x1701   :  { %v1174_v16 = vpop.f32.mrf.mxu1 }
0x1702   :  { %v1178_v17 = vadd.f32 %v1174_v16, %v1692_v43  ;;  %v61_v43 = vld [vmem:[#allocation5 + $0xc0] sm:$0xff] }
0x1703   :  { %v1176_v30 = vpop.f32.mrf.mxu1  ;;  %1343 = vmatpush3.msra.mxu0 %v61_v43 }
0x1704   :  { %v1334_v36 = vmul.f32 -1.442695, %v1178_v17  ;;  %1344 = vmatprep.subr.mxu0 %v1550_v35 }
0x1705   :  { %1345 = vmatpush3.msra.mxu0 %v60_v48 }
0x1706   :  { %1468 = vpow2.f32 %v1334_v36  ;;  %1346 = vmatprep.subr.mxu0 %v1550_v35 }
0x1707   :  { %1347 = vmatpush3.msra.mxu0 %v59_v18 }
0x1708   :  { %1348 = vmatprep.subr.mxu0 %v1550_v35 }
0x1709   :  { %1349 = vmatpush3.msra.mxu0 %v58_v49 }
0x1713   :  { %v1469_v37 = vpop.eup %1468 }
0x1714   :  { %v1182_v38 = vadd.f32 1.0, %v1469_v37 }
0x1716   :  { %1470 = vrcp.f32 %v1182_v38 }
0x1723   :  { %v1471_v39 = vpop.eup %1470 }
0x1724   :  { %v1185_v40 = vmul.f32 2.0, %v1471_v39  ;;  %v1187_v45 = vmul.f32 %v1471_v39, %v1055_v25 }
0x1726   :  { %v1335_v41 = vadd.f32 -1.0, %v1185_v40 }
0x1728   :  { %1189 = vrot.lane.b32.xlu0 %v1335_v41, %s1548_s0 }
0x179a   :  { %v1190_v42 = vpop.permute.xlu0 %1189 }
0x179b   :  { %v1192_v44 = vmul.f32 %v1471_v39, %v1190_v42 }
0x179d   :  { %1194 = vrot.lane.b32.xlu1 %v1192_v44, %s1549_s1 }
0x180f   :  { %v1195_v46 = vpop.permute.xlu1 %1194 }
0x1810   :  { %v1197_v47 = vadd.f32 %v1195_v46, %v1187_v45 }
0x1812   :  { %1472 = vtanh.f32 %v1197_v47 }
0x181f   :  { %v1473_v50 = vpop.eup %1472 }
0x1820   :  { %1200 = vrot.lane.b32.xlu0 %v1473_v50, %s1548_s0 }
0x1892   :  { %v1201_v51 = vpop.permute.xlu0 %1200 }
0x1893   :  { %v1203_v52 = vmul.f32 %v1471_v39, %v1201_v51 }
0x1895   :  { %1205 = vrot.lane.b32.xlu1 %v1203_v52, %s1549_s1 }
0x1907   :  { %v1206_v53 = vpop.permute.xlu1 %1205 }
0x1908   :  { %1351 = vmatmul.mubr.msk.f32.vlgmr.msra.gmra.mxu0 %vm100_vm0, %v1206_v53 }
0x19c8   :  { %v1275_v55 = vpop.f32.mrf.mxu0 }
0x19c9   :  { %v1276_v56 = vadd.f32 %v1275_v55, %v41_v54 }
0x19ca   :  { %v1352_v57 = vpop.f32.mrf.mxu0 }
0x19cb   :  { %1279 = vst [vmem:[#allocation7] sm:$0x3] %v1276_v56 }
0x19cc   :  { %1528 = shalt.err (!%p1525_p0)
}
0x19cd   :  { %1289 = dma.vmem_to_hbm [thread:$0]  %s1287_s22, 32, %s1934_s2, [#allocation4]  }
0x19ce   :  { %1541 = dma.done.wait [#allocation4], 32  }
0x19cf   :  { %1542 = vsyncadd [#allocation4], 4294967264 }
0x19d0   :  { %1293 = vsyncpa [#allocation3], 1 }
0x19d1   :  { %1294 = vsyncpa [#allocation6], 1 }
0x19d2   :  { %1295 = vsyncpa [#allocation4], 1 }

</bundles_post_ra>
